<compile_context>
chip_gen: v7x
topology: tpu7x:2x2x1
jax: 0.10.0
libtpu: 0.0.40
codegen_flags: <defaults>
</compile_context>

<pallas_src>
import functools
import math

import jax
import jax.numpy as jnp
from jax import lax
from jax.experimental import pallas as pl
from jax.experimental.pallas import tpu as pltpu

# ----------------------- small, shape-consistent hyper-params ---------------
BATCH     = 2
IN_CHANS  = 3
IMG_SIZE  = 32          # module uses 224; small spatial size for the demo
PATCH     = 16          # same patch size as deit_base_patch16
EMBED_DIM = 128         # "vision_width" (768 in vit_base); 128 = full lane width
DEPTH     = 2           # 12 in vit_base
NUM_HEADS = 4
HEAD_DIM  = EMBED_DIM // NUM_HEADS
MLP_DIM   = 4 * EMBED_DIM
LN_EPS    = 1e-6        # BLIP/timm ViT uses LayerNorm(eps=1e-6)

NUM_PATCHES = (IMG_SIZE // PATCH) ** 2
NUM_TOKENS  = NUM_PATCHES + 1

_INV_SQRT2 = 1.0 / math.sqrt(2.0)


# ------------------------------ kernel helpers -------------------------------
def _ln_f32(x, g, b, eps):
    """LayerNorm in f32 over the last axis; g/b are (1, D)."""
    mean = jnp.mean(x, axis=-1, keepdims=True)
    cent = x - mean
    var = jnp.mean(cent * cent, axis=-1, keepdims=True)
    return cent * lax.rsqrt(var + eps) * g + b


# ------------------------------ Pallas kernels -------------------------------
def _embed_kernel(patch_ref, w_ref, b_ref, cls_ref, pos_ref, o_ref):
    """Patch-embed matmul + bias, prepend cls token, add positional embedding.
    One grid step per batch element."""
    f32 = jnp.float32
    patches = patch_ref[0].astype(jnp.bfloat16)                  # (Np, C*p*p)
    tok = jnp.dot(patches, w_ref[...], preferred_element_type=f32)
    tok = tok + b_ref[...].astype(f32)                           # (Np, D)
    pos = pos_ref[0].astype(f32)                                 # (N, D)
    cls_row = cls_ref[...].astype(f32) + pos[0:1, :]             # (1, D)
    out = jnp.concatenate([cls_row, tok + pos[1:, :]], axis=0)   # (N, D)
    o_ref[0] = out.astype(o_ref.dtype)


def _block_kernel(x_ref, ln1_g_ref, ln1_b_ref, qkv_w_ref, qkv_b_ref,
                  proj_w_ref, proj_b_ref, ln2_g_ref, ln2_b_ref,
                  fc1_w_ref, fc1_b_ref, fc2_w_ref, fc2_b_ref, o_ref):
    """Fused timm Block: x += Attn(LN1(x)); x += MLP(LN2(x)).
    Dropouts are identity in eval mode.  One grid step per batch element."""
    f32, bf16 = jnp.float32, jnp.bfloat16
    D = EMBED_DIM
    x = x_ref[0].astype(f32)                                     # (N, D)

    # ---- attention branch: LN1 -> qkv -> per-head softmax(qk^T)v -> proj ----
    h = _ln_f32(x, ln1_g_ref[...].astype(f32), ln1_b_ref[...].astype(f32), LN_EPS)
    qkv = jnp.dot(h.astype(bf16), qkv_w_ref[...], preferred_element_type=f32)
    qkv = qkv + qkv_b_ref[...].astype(f32)                       # (N, 3D)

    scale = HEAD_DIM ** -0.5
    head_outs = []
    for hd in range(NUM_HEADS):                                  # static unroll
        lo = hd * HEAD_DIM
        q = qkv[:, lo:lo + HEAD_DIM] * scale                     # scale folded into q
        k = qkv[:, D + lo:D + lo + HEAD_DIM]
        v = qkv[:, 2 * D + lo:2 * D + lo + HEAD_DIM]
        s = lax.dot_general(q.astype(bf16), k.astype(bf16),
                            (((1,), (1,)), ((), ())),
                            preferred_element_type=f32)          # (N, N), no .T
        m = jnp.max(s, axis=-1, keepdims=True)
        p = jnp.exp(s - m)
        p = p * pl.reciprocal(jnp.sum(p, axis=-1, keepdims=True), approx=True)
        head_outs.append(jnp.dot(p.astype(bf16), v.astype(bf16),
                                 preferred_element_type=f32))    # (N, dh)
    attn = jnp.concatenate(head_outs, axis=-1)                   # (N, D) token-major
    attn = jnp.dot(attn.astype(bf16), proj_w_ref[...], preferred_element_type=f32)
    attn = attn + proj_b_ref[...].astype(f32)
    x = x + attn                                                 # residual 1 (f32)

    # ---- MLP branch: LN2 -> fc1 + exact GELU -> fc2 ----
    h = _ln_f32(x, ln2_g_ref[...].astype(f32), ln2_b_ref[...].astype(f32), LN_EPS)
    u = jnp.dot(h.astype(bf16), fc1_w_ref[...], preferred_element_type=f32)
    u = u + fc1_b_ref[...].astype(f32)
    u = 0.5 * u * (1.0 + lax.erf(u * _INV_SQRT2))                # nn.GELU (erf form)
    d = jnp.dot(u.astype(bf16), fc2_w_ref[...], preferred_element_type=f32)
    d = d + fc2_b_ref[...].astype(f32)
    x = x + d                                                    # residual 2 (f32)

    o_ref[0] = x.astype(o_ref.dtype)


def _final_ln_kernel(x_ref, g_ref, b_ref, o_ref):
    f32 = jnp.float32
    y = _ln_f32(x_ref[0].astype(f32),
                g_ref[...].astype(f32), b_ref[...].astype(f32), LN_EPS)
    o_ref[0] = y.astype(o_ref.dtype)


# ------------------------------ call wrappers --------------------------------
def _const_spec(shape):
    """Full-array block that is the same for every grid step (weights/biases).
    Block == full dims, so it satisfies the (8,128) rule."""
    n = len(shape)
    return pl.BlockSpec(shape, lambda b, _n=n: (0,) * _n)


def embed_tokens(patches, params):
    B, Np, Cpp = patches.shape
    N, D = NUM_TOKENS, EMBED_DIM
    return pl.pallas_call(
        _embed_kernel,
        out_shape=jax.ShapeDtypeStruct((B, N, D), jnp.float32),
        grid=(B,),
        in_specs=[
            pl.BlockSpec((1, Np, Cpp), lambda b: (b, 0, 0)),
            _const_spec((Cpp, D)),
            _const_spec((1, D)),
            _const_spec((1, D)),
            _const_spec((1, N, D)),
        ],
        out_specs=pl.BlockSpec((1, N, D), lambda b: (b, 0, 0)),
        compiler_params=pltpu.CompilerParams(dimension_semantics=("parallel",)),
    )(patches, params["patch_w"], params["patch_b"],
      params["cls_token"], params["pos_embed"])


def _block_cost(B, N, D, H, M):
    flops = B * (2 * N * D * 3 * D          # qkv
                 + 4 * N * N * D            # qk^T + pv over all heads
                 + 2 * N * D * D            # proj
                 + 4 * N * D * M)           # fc1 + fc2
    transcendentals = B * (H * N * N + N * M + 2 * N)        # exp, erf, rsqrt/rcp
    bytes_accessed = (2 * B * N * D * 4                      # x in + out (f32)
                      + (3 * D * D + D * D + 2 * D * M) * 2  # bf16 weights
                      + (3 * D + 6 * D + M) * 4)             # f32 biases / LN params
    return pl.CostEstimate(flops=flops, transcendentals=transcendentals,
                           bytes_accessed=bytes_accessed)


def block_forward(x, p):
    B, N, D = x.shape
    M = MLP_DIM
    return pl.pallas_call(
        _block_kernel,
        out_shape=jax.ShapeDtypeStruct((B, N, D), x.dtype),
        grid=(B,),
        in_specs=[
            pl.BlockSpec((1, N, D), lambda b: (b, 0, 0)),       # tokens
            _const_spec((1, D)), _const_spec((1, D)),           # ln1 g/b
            _const_spec((D, 3 * D)), _const_spec((1, 3 * D)),   # qkv w/b
            _const_spec((D, D)), _const_spec((1, D)),           # proj w/b
            _const_spec((1, D)), _const_spec((1, D)),           # ln2 g/b
            _const_spec((D, M)), _const_spec((1, M)),           # fc1 w/b
            _const_spec((M, D)), _const_spec((1, D)),           # fc2 w/b
        ],
        out_specs=pl.BlockSpec((1, N, D), lambda b: (b, 0, 0)),
        compiler_params=pltpu.CompilerParams(dimension_semantics=("parallel",)),
        cost_estimate=_block_cost(B, N, D, NUM_HEADS, M),
    )(x, p["ln1_g"], p["ln1_b"], p["qkv_w"], p["qkv_b"],
      p["proj_w"], p["proj_b"], p["ln2_g"], p["ln2_b"],
      p["fc1_w"], p["fc1_b"], p["fc2_w"], p["fc2_b"])


def final_layernorm(x, g, b):
    B, N, D = x.shape
    return pl.pallas_call(
        _final_ln_kernel,
        out_shape=jax.ShapeDtypeStruct((B, N, D), x.dtype),
        grid=(B,),
        in_specs=[pl.BlockSpec((1, N, D), lambda i: (i, 0, 0)),
                  _const_spec((1, D)), _const_spec((1, D))],
        out_specs=pl.BlockSpec((1, N, D), lambda i: (i, 0, 0)),
        compiler_params=pltpu.CompilerParams(dimension_semantics=("parallel",)),
    )(x, g, b)


# ------------------------------ parameters ----------------------------------
def init_params(key):
    # TODO(synk): the original module loads deit_base_patch16_224 weights from
    # a .pth checkpoint; parameters here are initialized deterministically.
    keys = jax.random.split(key, 3 + DEPTH)

    def nrm(k, shape, std=0.02, dtype=jnp.float32):
        return (std * jax.random.normal(k, shape)).astype(dtype)

    params = {
        # Conv2d(3, D, kernel=16, stride=16) folded into a (C*p*p, D) matmul
        # over im2col patches (channel-major per patch, matching PyTorch's
        # w[d, c, kh, kw] ordering).  Weights stored in bf16 for the MXU.
        "patch_w": nrm(keys[0], (IN_CHANS * PATCH * PATCH, EMBED_DIM), dtype=jnp.bfloat16),
        "patch_b": jnp.zeros((1, EMBED_DIM), jnp.float32),
        "cls_token": nrm(keys[1], (1, EMBED_DIM)),
        "pos_embed": nrm(keys[2], (1, NUM_TOKENS, EMBED_DIM)),
        "norm_g": jnp.ones((1, EMBED_DIM), jnp.float32),
        "norm_b": jnp.zeros((1, EMBED_DIM), jnp.float32),
        "blocks": [],
    }
    for d in range(DEPTH):
        bkeys = jax.random.split(keys[3 + d], 4)
        params["blocks"].append({
            "ln1_g": jnp.ones((1, EMBED_DIM), jnp.float32),
            "ln1_b": jnp.zeros((1, EMBED_DIM), jnp.float32),
            "qkv_w": nrm(bkeys[0], (EMBED_DIM, 3 * EMBED_DIM), dtype=jnp.bfloat16),
            "qkv_b": jnp.zeros((1, 3 * EMBED_DIM), jnp.float32),
            "proj_w": nrm(bkeys[1], (EMBED_DIM, EMBED_DIM), dtype=jnp.bfloat16),
            "proj_b": jnp.zeros((1, EMBED_DIM), jnp.float32),
            "ln2_g": jnp.ones((1, EMBED_DIM), jnp.float32),
            "ln2_b": jnp.zeros((1, EMBED_DIM), jnp.float32),
            "fc1_w": nrm(bkeys[2], (EMBED_DIM, MLP_DIM), dtype=jnp.bfloat16),
            "fc1_b": jnp.zeros((1, MLP_DIM), jnp.float32),
            "fc2_w": nrm(bkeys[3], (MLP_DIM, EMBED_DIM), dtype=jnp.bfloat16),
            "fc2_b": jnp.zeros((1, EMBED_DIM), jnp.float32),
        })
    return params


# ------------------------------ forward pass --------------------------------
def image_encoder_vit_forward(x, params):
    """x: (B, C, H, W) float32 (NCHW) -> (cls_feat (B, D), patch_feat (B, Np, D)).
    Mirrors: img_feat = self.model(x, register_blk=11);
             return img_feat[:, 0], img_feat[:, 1:]."""
    B, C, H, W = x.shape
    nh, nw = H // PATCH, W // PATCH

    # im2col for the kernel=stride=16 patch-embed conv (pure layout glue); the
    # conv arithmetic is the fused Pallas matmul inside embed_tokens.
    patches = x.reshape(B, C, nh, PATCH, nw, PATCH)
    patches = jnp.transpose(patches, (0, 2, 4, 1, 3, 5))     # (B, nh, nw, C, p, p)
    patches = patches.reshape(B, nh * nw, C * PATCH * PATCH)

    xt = embed_tokens(patches, params)                       # (B, N, D) f32

    # register_blk=11 only records attention maps in the torch model; it does
    # not change the output, so it has no kernel-side effect here.
    for blk in params["blocks"]:
        xt = block_forward(xt, blk)

    img_feat = final_layernorm(xt, params["norm_g"], params["norm_b"])
    return img_feat[:, 0], img_feat[:, 1:]


# --------------------- pure-JAX f32 reference (sanity check) -----------------
def _reference_forward(x, params):
    def ln(t, g, b):
        mu = jnp.mean(t, -1, keepdims=True)
        c = t - mu
        v = jnp.mean(c * c, -1, keepdims=True)
        return c * lax.rsqrt(v + LN_EPS) * g + b

    B, C, H, W = x.shape
    nh, nw = H // PATCH, W // PATCH
    p = x.reshape(B, C, nh, PATCH, nw, PATCH).transpose(0, 2, 4, 1, 3, 5)
    p = p.reshape(B, nh * nw, C * PATCH * PATCH)
    tok = p @ params["patch_w"].astype(jnp.float32) + params["patch_b"]
    cls = jnp.broadcast_to(params["cls_token"][None], (B, 1, EMBED_DIM))
    xt = jnp.concatenate([cls, tok], axis=1) + params["pos_embed"]
    for blk in params["blocks"]:
        h = ln(xt, blk["ln1_g"], blk["ln1_b"])
        qkv = h @ blk["qkv_w"].astype(jnp.float32) + blk["qkv_b"]
        qkv = qkv.reshape(B, NUM_TOKENS, 3, NUM_HEADS, HEAD_DIM)
        q = jnp.transpose(qkv[:, :, 0], (0, 2, 1, 3)) * HEAD_DIM ** -0.5
        k = jnp.transpose(qkv[:, :, 1], (0, 2, 1, 3))
        v = jnp.transpose(qkv[:, :, 2], (0, 2, 1, 3))
        s = jnp.einsum("bhqd,bhkd->bhqk", q, k)
        a = jnp.einsum("bhqk,bhkd->bhqd", jax.nn.softmax(s, axis=-1), v)
        a = jnp.transpose(a, (0, 2, 1, 3)).reshape(B, NUM_TOKENS, EMBED_DIM)
        xt = xt + (a @ blk["proj_w"].astype(jnp.float32) + blk["proj_b"])
        h = ln(xt, blk["ln2_g"], blk["ln2_b"])
        u = h @ blk["fc1_w"].astype(jnp.float32) + blk["fc1_b"]
        u = 0.5 * u * (1.0 + lax.erf(u * _INV_SQRT2))
        xt = xt + (u @ blk["fc2_w"].astype(jnp.float32) + blk["fc2_b"])
    xt = ln(xt, params["norm_g"], params["norm_b"])
    return xt[:, 0], xt[:, 1:]


# ---------------------------------- main -------------------------------------
if __name__ == "__main__":
    key = jax.random.PRNGKey(0)
    pkey, xkey = jax.random.split(key)
    params = init_params(pkey)
    x = jax.random.normal(xkey, (BATCH, IN_CHANS, IMG_SIZE, IMG_SIZE), jnp.float32)

    fwd = jax.jit(functools.partial(image_encoder_vit_forward, params=params))
    cls_feat, patch_feat = fwd(x)
    jax.block_until_ready((cls_feat, patch_feat))

    assert cls_feat.shape == (BATCH, EMBED_DIM)
    assert patch_feat.shape == (BATCH, NUM_PATCHES, EMBED_DIM)
    assert jnp.all(jnp.isfinite(cls_feat)) and jnp.all(jnp.isfinite(patch_feat))

    # Loose numerical check against pure-JAX f32 reference (kernel uses bf16
    # matmul operands + approx reciprocal in softmax, hence the tolerance).
    ref_cls, ref_patch = _reference_forward(x, params)
    assert jnp.max(jnp.abs(cls_feat - ref_cls)) < 1e-1
    assert jnp.max(jnp.abs(patch_feat - ref_patch)) < 1e-1

    print("KERNEL_OK")
</pallas_src>

<mosaic_0001>
module attributes {stable_mosaic.version = 11 : i64} {
  func.func @_embed_kernel(%arg0: i32, %arg1: memref<1x4x768xf32, #tpu.memory_space<vmem>>, %arg2: memref<768x128xbf16, #tpu.memory_space<vmem>>, %arg3: memref<1x128xf32, #tpu.memory_space<vmem>>, %arg4: memref<1x128xf32, #tpu.memory_space<vmem>>, %arg5: memref<1x5x128xf32, #tpu.memory_space<vmem>>, %arg6: memref<1x5x128xf32, #tpu.memory_space<vmem>>) attributes {dimension_semantics = [#tpu.dimension_semantics<parallel>], iteration_bounds = array<i64: 2>, scalar_prefetch = 0 : i64, scratch_operands = 0 : i64, tpu.core_type = #tpu.core_type<tc>, window_params = [{transform_indices = @transform_0, window_bounds = array<i64: 1, 4, 768>}, {pipeline_mode = #tpu.pipeline_mode<synchronous>, transform_indices = @transform_1, window_bounds = array<i64: 768, 128>}, {pipeline_mode = #tpu.pipeline_mode<synchronous>, transform_indices = @transform_2, window_bounds = array<i64: 1, 128>}, {pipeline_mode = #tpu.pipeline_mode<synchronous>, transform_indices = @transform_3, window_bounds = array<i64: 1, 128>}, {pipeline_mode = #tpu.pipeline_mode<synchronous>, transform_indices = @transform_4, window_bounds = array<i64: 1, 5, 128>}, {transform_indices = @transform_5, window_bounds = array<i64: 1, 5, 128>}]} {
    %c0 = arith.constant 0 : index
    %c0_0 = arith.constant 0 : index
    %c0_1 = arith.constant 0 : index
    %0 = vector.load %arg1[%c0, %c0_0, %c0_1] : memref<1x4x768xf32, #tpu.memory_space<vmem>>, vector<1x4x768xf32>
    %1 = vector.shape_cast %0 : vector<1x4x768xf32> to vector<4x768xf32>
    %2 = arith.truncf %1 : vector<4x768xf32> to vector<4x768xbf16>
    %c0_2 = arith.constant 0 : index
    %c0_3 = arith.constant 0 : index
    %3 = vector.load %arg2[%c0_2, %c0_3] : memref<768x128xbf16, #tpu.memory_space<vmem>>, vector<768x128xbf16>
    %cst = arith.constant dense<0.000000e+00> : vector<4x128xf32>
    %4 = tpu.matmul %2, %3, %cst {dimension_numbers = #tpu.dot_dimension_numbers<[1], [0], [0], [1], [0, 0, 1, 1], [], []>} : vector<4x768xbf16>, vector<768x128xbf16>, vector<4x128xf32> -> vector<4x128xf32>
    %c0_4 = arith.constant 0 : index
    %c0_5 = arith.constant 0 : index
    %5 = vector.load %arg3[%c0_4, %c0_5] : memref<1x128xf32, #tpu.memory_space<vmem>>, vector<1x128xf32>
    %6 = vector.broadcast %5 : vector<1x128xf32> to vector<4x128xf32>
    %7 = arith.addf %4, %6 : vector<4x128xf32>
    %c0_6 = arith.constant 0 : index
    %c0_7 = arith.constant 0 : index
    %c0_8 = arith.constant 0 : index
    %8 = vector.load %arg5[%c0_6, %c0_7, %c0_8] : memref<1x5x128xf32, #tpu.memory_space<vmem>>, vector<1x5x128xf32>
    %9 = vector.shape_cast %8 : vector<1x5x128xf32> to vector<5x128xf32>
    %c0_9 = arith.constant 0 : index
    %c0_10 = arith.constant 0 : index
    %10 = vector.load %arg4[%c0_9, %c0_10] : memref<1x128xf32, #tpu.memory_space<vmem>>, vector<1x128xf32>
    %11 = vector.extract_strided_slice %9 {offsets = [0, 0], sizes = [1, 128], strides = [1, 1]} : vector<5x128xf32> to vector<1x128xf32>
    %12 = arith.addf %10, %11 : vector<1x128xf32>
    %13 = vector.extract_strided_slice %9 {offsets = [1, 0], sizes = [4, 128], strides = [1, 1]} : vector<5x128xf32> to vector<4x128xf32>
    %14 = arith.addf %7, %13 : vector<4x128xf32>
    %15 = tpu.concatenate %12, %14 in 0 : vector<1x128xf32>, vector<4x128xf32> -> vector<5x128xf32>
    %c0_11 = arith.constant 0 : index
    %c0_12 = arith.constant 0 : index
    %c0_13 = arith.constant 0 : index
    %16 = vector.load %arg6[%c0_11, %c0_12, %c0_13] : memref<1x5x128xf32, #tpu.memory_space<vmem>>, vector<1x5x128xf32>
    %17 = vector.shape_cast %16 : vector<1x5x128xf32> to vector<5x128xf32>
    %18 = vector.shape_cast %15 : vector<5x128xf32> to vector<1x5x128xf32>
    tpu.vector_store %arg6[%c0_11, %c0_12, %c0_13], %18 {strides = array<i32>} : memref<1x5x128xf32, #tpu.memory_space<vmem>>, vector<1x5x128xf32>,
    return
  }
  func.func @transform_0(%arg0: i32) -> (i32, i32, i32) {
    %c0_i32 = arith.constant 0 : i32
    %c0_i32_0 = arith.constant 0 : i32
    %c0_i32_1 = arith.constant 0 : i32
    return %arg0, %c0_i32, %c0_i32_0 : i32, i32, i32
  }
  func.func @transform_1(%arg0: i32) -> (i32, i32) {
    %c0_i32 = arith.constant 0 : i32
    %c0_i32_0 = arith.constant 0 : i32
    %c0_i32_1 = arith.constant 0 : i32
    return %c0_i32, %c0_i32_0 : i32, i32
  }
  func.func @transform_2(%arg0: i32) -> (i32, i32) {
    %c0_i32 = arith.constant 0 : i32
    %c0_i32_0 = arith.constant 0 : i32
    %c0_i32_1 = arith.constant 0 : i32
    return %c0_i32, %c0_i32_0 : i32, i32
  }
  func.func @transform_3(%arg0: i32) -> (i32, i32) {
    %c0_i32 = arith.constant 0 : i32
    %c0_i32_0 = arith.constant 0 : i32
    %c0_i32_1 = arith.constant 0 : i32
    return %c0_i32, %c0_i32_0 : i32, i32
  }
  func.func @transform_4(%arg0: i32) -> (i32, i32, i32) {
    %c0_i32 = arith.constant 0 : i32
    %c0_i32_0 = arith.constant 0 : i32
    %c0_i32_1 = arith.constant 0 : i32
    %c0_i32_2 = arith.constant 0 : i32
    return %c0_i32, %c0_i32_0, %c0_i32_1 : i32, i32, i32
  }
  func.func @transform_5(%arg0: i32) -> (i32, i32, i32) {
    %c0_i32 = arith.constant 0 : i32
    %c0_i32_0 = arith.constant 0 : i32
    %c0_i32_1 = arith.constant 0 : i32
    return %arg0, %c0_i32, %c0_i32_0 : i32, i32, i32
  }
}

module attributes {stable_mosaic.version = 11 : i64} {
  func.func @_final_ln_kernel(%arg0: i32, %arg1: memref<1x5x128xf32, #tpu.memory_space<vmem>>, %arg2: memref<1x128xf32, #tpu.memory_space<vmem>>, %arg3: memref<1x128xf32, #tpu.memory_space<vmem>>, %arg4: memref<1x5x128xf32, #tpu.memory_space<vmem>>) attributes {dimension_semantics = [#tpu.dimension_semantics<parallel>], iteration_bounds = array<i64: 2>, scalar_prefetch = 0 : i64, scratch_operands = 0 : i64, tpu.core_type = #tpu.core_type<tc>, window_params = [{transform_indices = @transform_0, window_bounds = array<i64: 1, 5, 128>}, {pipeline_mode = #tpu.pipeline_mode<synchronous>, transform_indices = @transform_1, window_bounds = array<i64: 1, 128>}, {pipeline_mode = #tpu.pipeline_mode<synchronous>, transform_indices = @transform_2, window_bounds = array<i64: 1, 128>}, {transform_indices = @transform_3, window_bounds = array<i64: 1, 5, 128>}]} {
    %c0 = arith.constant 0 : index
    %c0_0 = arith.constant 0 : index
    %c0_1 = arith.constant 0 : index
    %0 = vector.load %arg1[%c0, %c0_0, %c0_1] : memref<1x5x128xf32, #tpu.memory_space<vmem>>, vector<1x5x128xf32>
    %1 = vector.shape_cast %0 : vector<1x5x128xf32> to vector<5x128xf32>
    %c0_2 = arith.constant 0 : index
    %c0_3 = arith.constant 0 : index
    %2 = vector.load %arg2[%c0_2, %c0_3] : memref<1x128xf32, #tpu.memory_space<vmem>>, vector<1x128xf32>
    %c0_4 = arith.constant 0 : index
    %c0_5 = arith.constant 0 : index
    %3 = vector.load %arg3[%c0_4, %c0_5] : memref<1x128xf32, #tpu.memory_space<vmem>>, vector<1x128xf32>
    %cst = arith.constant dense<0.000000e+00> : vector<5xf32>
    %4 = vector.multi_reduction <add>, %1, %cst [1] : vector<5x128xf32> to vector<5xf32>
    %5 = vector.shape_cast %4 : vector<5xf32> to vector<5x1xf32>
    %cst_6 = arith.constant 1.280000e+02 : f32
    %6 = vector.broadcast %cst_6 : f32 to vector<5x1xf32>
    %7 = arith.divf %5, %6 : vector<5x1xf32>
    %8 = vector.broadcast %7 : vector<5x1xf32> to vector<5x128xf32>
    %9 = arith.subf %1, %8 : vector<5x128xf32>
    %10 = arith.mulf %9, %9 : vector<5x128xf32>
    %cst_7 = arith.constant dense<0.000000e+00> : vector<5xf32>
    %11 = vector.multi_reduction <add>, %10, %cst_7 [1] : vector<5x128xf32> to vector<5xf32>
    %12 = vector.shape_cast %11 : vector<5xf32> to vector<5x1xf32>
    %cst_8 = arith.constant 1.280000e+02 : f32
    %13 = vector.broadcast %cst_8 : f32 to vector<5x1xf32>
    %14 = arith.divf %12, %13 : vector<5x1xf32>
    %cst_9 = arith.constant 9.99999997E-7 : f32
    %15 = vector.broadcast %cst_9 : f32 to vector<5x1xf32>
    %16 = arith.addf %14, %15 : vector<5x1xf32>
    %17 = math.rsqrt %16 : vector<5x1xf32>
    %18 = vector.broadcast %17 : vector<5x1xf32> to vector<5x128xf32>
    %19 = arith.mulf %9, %18 : vector<5x128xf32>
    %20 = vector.broadcast %2 : vector<1x128xf32> to vector<5x128xf32>
    %21 = arith.mulf %19, %20 : vector<5x128xf32>
    %22 = vector.broadcast %3 : vector<1x128xf32> to vector<5x128xf32>
    %23 = arith.addf %21, %22 : vector<5x128xf32>
    %c0_10 = arith.constant 0 : index
    %c0_11 = arith.constant 0 : index
    %c0_12 = arith.constant 0 : index
    %24 = vector.load %arg4[%c0_10, %c0_11, %c0_12] : memref<1x5x128xf32, #tpu.memory_space<vmem>>, vector<1x5x128xf32>
    %25 = vector.shape_cast %24 : vector<1x5x128xf32> to vector<5x128xf32>
    %26 = vector.shape_cast %23 : vector<5x128xf32> to vector<1x5x128xf32>
    tpu.vector_store %arg4[%c0_10, %c0_11, %c0_12], %26 {strides = array<i32>} : memref<1x5x128xf32, #tpu.memory_space<vmem>>, vector<1x5x128xf32>,
    return
  }
  func.func @transform_0(%arg0: i32) -> (i32, i32, i32) {
    %c0_i32 = arith.constant 0 : i32
    %c0_i32_0 = arith.constant 0 : i32
    %c0_i32_1 = arith.constant 0 : i32
    return %arg0, %c0_i32, %c0_i32_0 : i32, i32, i32
  }
  func.func @transform_1(%arg0: i32) -> (i32, i32) {
    %c0_i32 = arith.constant 0 : i32
    %c0_i32_0 = arith.constant 0 : i32
    %c0_i32_1 = arith.constant 0 : i32
    return %c0_i32, %c0_i32_0 : i32, i32
  }
  func.func @transform_2(%arg0: i32) -> (i32, i32) {
    %c0_i32 = arith.constant 0 : i32
    %c0_i32_0 = arith.constant 0 : i32
    %c0_i32_1 = arith.constant 0 : i32
    return %c0_i32, %c0_i32_0 : i32, i32
  }
  func.func @transform_3(%arg0: i32) -> (i32, i32, i32) {
    %c0_i32 = arith.constant 0 : i32
    %c0_i32_0 = arith.constant 0 : i32
    %c0_i32_1 = arith.constant 0 : i32
    return %arg0, %c0_i32, %c0_i32_0 : i32, i32, i32
  }
}

module attributes {stable_mosaic.version = 11 : i64} {
  func.func @_block_kernel(%arg0: i32, %arg1: memref<1x5x128xf32, #tpu.memory_space<vmem>>, %arg2: memref<1x128xf32, #tpu.memory_space<vmem>>, %arg3: memref<1x128xf32, #tpu.memory_space<vmem>>, %arg4: memref<128x384xbf16, #tpu.memory_space<vmem>>, %arg5: memref<1x384xf32, #tpu.memory_space<vmem>>, %arg6: memref<128x128xbf16, #tpu.memory_space<vmem>>, %arg7: memref<1x128xf32, #tpu.memory_space<vmem>>, %arg8: memref<1x128xf32, #tpu.memory_space<vmem>>, %arg9: memref<1x128xf32, #tpu.memory_space<vmem>>, %arg10: memref<128x512xbf16, #tpu.memory_space<vmem>>, %arg11: memref<1x512xf32, #tpu.memory_space<vmem>>, %arg12: memref<512x128xbf16, #tpu.memory_space<vmem>>, %arg13: memref<1x128xf32, #tpu.memory_space<vmem>>, %arg14: memref<1x5x128xf32, #tpu.memory_space<vmem>>) attributes {dimension_semantics = [#tpu.dimension_semantics<parallel>], iteration_bounds = array<i64: 2>, scalar_prefetch = 0 : i64, scratch_operands = 0 : i64, tpu.core_type = #tpu.core_type<tc>, window_params = [{transform_indices = @transform_0, window_bounds = array<i64: 1, 5, 128>}, {pipeline_mode = #tpu.pipeline_mode<synchronous>, transform_indices = @transform_1, window_bounds = array<i64: 1, 128>}, {pipeline_mode = #tpu.pipeline_mode<synchronous>, transform_indices = @transform_2, window_bounds = array<i64: 1, 128>}, {pipeline_mode = #tpu.pipeline_mode<synchronous>, transform_indices = @transform_3, window_bounds = array<i64: 128, 384>}, {pipeline_mode = #tpu.pipeline_mode<synchronous>, transform_indices = @transform_4, window_bounds = array<i64: 1, 384>}, {pipeline_mode = #tpu.pipeline_mode<synchronous>, transform_indices = @transform_5, window_bounds = array<i64: 128, 128>}, {pipeline_mode = #tpu.pipeline_mode<synchronous>, transform_indices = @transform_6, window_bounds = array<i64: 1, 128>}, {pipeline_mode = #tpu.pipeline_mode<synchronous>, transform_indices = @transform_7, window_bounds = array<i64: 1, 128>}, {pipeline_mode = #tpu.pipeline_mode<synchronous>, transform_indices = @transform_8, window_bounds = array<i64: 1, 128>}, {pipeline_mode = #tpu.pipeline_mode<synchronous>, transform_indices = @transform_9, window_bounds = array<i64: 128, 512>}, {pipeline_mode = #tpu.pipeline_mode<synchronous>, transform_indices = @transform_10, window_bounds = array<i64: 1, 512>}, {pipeline_mode = #tpu.pipeline_mode<synchronous>, transform_indices = @transform_11, window_bounds = array<i64: 512, 128>}, {pipeline_mode = #tpu.pipeline_mode<synchronous>, transform_indices = @transform_12, window_bounds = array<i64: 1, 128>}, {transform_indices = @transform_13, window_bounds = array<i64: 1, 5, 128>}]} {
    %c0 = arith.constant 0 : index
    %c0_0 = arith.constant 0 : index
    %c0_1 = arith.constant 0 : index
    %0 = vector.load %arg1[%c0, %c0_0, %c0_1] : memref<1x5x128xf32, #tpu.memory_space<vmem>>, vector<1x5x128xf32>
    %1 = vector.shape_cast %0 : vector<1x5x128xf32> to vector<5x128xf32>
    %c0_2 = arith.constant 0 : index
    %c0_3 = arith.constant 0 : index
    %2 = vector.load %arg2[%c0_2, %c0_3] : memref<1x128xf32, #tpu.memory_space<vmem>>, vector<1x128xf32>
    %c0_4 = arith.constant 0 : index
    %c0_5 = arith.constant 0 : index
    %3 = vector.load %arg3[%c0_4, %c0_5] : memref<1x128xf32, #tpu.memory_space<vmem>>, vector<1x128xf32>
    %cst = arith.constant dense<0.000000e+00> : vector<5xf32>
    %4 = vector.multi_reduction <add>, %1, %cst [1] : vector<5x128xf32> to vector<5xf32>
    %5 = vector.shape_cast %4 : vector<5xf32> to vector<5x1xf32>
    %cst_6 = arith.constant 1.280000e+02 : f32
    %6 = vector.broadcast %cst_6 : f32 to vector<5x1xf32>
    %7 = arith.divf %5, %6 : vector<5x1xf32>
    %8 = vector.broadcast %7 : vector<5x1xf32> to vector<5x128xf32>
    %9 = arith.subf %1, %8 : vector<5x128xf32>
    %10 = arith.mulf %9, %9 : vector<5x128xf32>
    %cst_7 = arith.constant dense<0.000000e+00> : vector<5xf32>
    %11 = vector.multi_reduction <add>, %10, %cst_7 [1] : vector<5x128xf32> to vector<5xf32>
    %12 = vector.shape_cast %11 : vector<5xf32> to vector<5x1xf32>
    %cst_8 = arith.constant 1.280000e+02 : f32
    %13 = vector.broadcast %cst_8 : f32 to vector<5x1xf32>
    %14 = arith.divf %12, %13 : vector<5x1xf32>
    %cst_9 = arith.constant 9.99999997E-7 : f32
    %15 = vector.broadcast %cst_9 : f32 to vector<5x1xf32>
    %16 = arith.addf %14, %15 : vector<5x1xf32>
    %17 = math.rsqrt %16 : vector<5x1xf32>
    %18 = vector.broadcast %17 : vector<5x1xf32> to vector<5x128xf32>
    %19 = arith.mulf %9, %18 : vector<5x128xf32>
    %20 = vector.broadcast %2 : vector<1x128xf32> to vector<5x128xf32>
    %21 = arith.mulf %19, %20 : vector<5x128xf32>
    %22 = vector.broadcast %3 : vector<1x128xf32> to vector<5x128xf32>
    %23 = arith.addf %21, %22 : vector<5x128xf32>
    %24 = arith.truncf %23 : vector<5x128xf32> to vector<5x128xbf16>
    %c0_10 = arith.constant 0 : index
    %c0_11 = arith.constant 0 : index
    %25 = vector.load %arg4[%c0_10, %c0_11] : memref<128x384xbf16, #tpu.memory_space<vmem>>, vector<128x384xbf16>
    %cst_12 = arith.constant dense<0.000000e+00> : vector<5x384xf32>
    %26 = tpu.matmul %24, %25, %cst_12 {dimension_numbers = #tpu.dot_dimension_numbers<[1], [0], [0], [1], [0, 0, 1, 1], [], []>} : vector<5x128xbf16>, vector<128x384xbf16>, vector<5x384xf32> -> vector<5x384xf32>
    %c0_13 = arith.constant 0 : index
    %c0_14 = arith.constant 0 : index
    %27 = vector.load %arg5[%c0_13, %c0_14] : memref<1x384xf32, #tpu.memory_space<vmem>>, vector<1x384xf32>
    %28 = vector.broadcast %27 : vector<1x384xf32> to vector<5x384xf32>
    %29 = arith.addf %26, %28 : vector<5x384xf32>
    %30 = vector.extract_strided_slice %29 {offsets = [0, 0], sizes = [5, 32], strides = [1, 1]} : vector<5x384xf32> to vector<5x32xf32>
    %cst_15 = arith.constant 0.176776692 : f32
    %31 = vector.broadcast %cst_15 : f32 to vector<5x32xf32>
    %32 = arith.mulf %30, %31 : vector<5x32xf32>
    %33 = vector.extract_strided_slice %29 {offsets = [0, 128], sizes = [5, 32], strides = [1, 1]} : vector<5x384xf32> to vector<5x32xf32>
    %34 = vector.extract_strided_slice %29 {offsets = [0, 256], sizes = [5, 32], strides = [1, 1]} : vector<5x384xf32> to vector<5x32xf32>
    %35 = arith.truncf %32 : vector<5x32xf32> to vector<5x32xbf16>
    %36 = arith.truncf %33 : vector<5x32xf32> to vector<5x32xbf16>
    %cst_16 = arith.constant dense<0.000000e+00> : vector<5x5xf32>
    %37 = tpu.matmul %35, %36, %cst_16 {dimension_numbers = #tpu.dot_dimension_numbers<[1], [1], [0], [0], [0, 0, 1, 0], [], []>} : vector<5x32xbf16>, vector<5x32xbf16>, vector<5x5xf32> -> vector<5x5xf32>
    %cst_17 = arith.constant dense<0xFF800000> : vector<5xf32>
    %38 = vector.multi_reduction <maximumf>, %37, %cst_17 [1] : vector<5x5xf32> to vector<5xf32>
    %39 = vector.shape_cast %38 : vector<5xf32> to vector<5x1xf32>
    %40 = vector.broadcast %39 : vector<5x1xf32> to vector<5x5xf32>
    %41 = arith.subf %37, %40 : vector<5x5xf32>
    %42 = math.exp %41 : vector<5x5xf32>
    %cst_18 = arith.constant dense<0.000000e+00> : vector<5xf32>
    %43 = vector.multi_reduction <add>, %42, %cst_18 [1] : vector<5x5xf32> to vector<5xf32>
    %44 = vector.shape_cast %43 : vector<5xf32> to vector<5x1xf32>
    %45 = tpu.reciprocal %44 {approx = true} : vector<5x1xf32> -> vector<5x1xf32>
    %46 = vector.broadcast %45 : vector<5x1xf32> to vector<5x5xf32>
    %47 = arith.mulf %42, %46 : vector<5x5xf32>
    %48 = arith.truncf %47 : vector<5x5xf32> to vector<5x5xbf16>
    %49 = arith.truncf %34 : vector<5x32xf32> to vector<5x32xbf16>
    %cst_19 = arith.constant dense<0.000000e+00> : vector<5x32xf32>
    %50 = tpu.matmul %48, %49, %cst_19 {dimension_numbers = #tpu.dot_dimension_numbers<[1], [0], [0], [1], [0, 0, 1, 1], [], []>} : vector<5x5xbf16>, vector<5x32xbf16>, vector<5x32xf32> -> vector<5x32xf32>
    %51 = vector.extract_strided_slice %29 {offsets = [0, 32], sizes = [5, 32], strides = [1, 1]} : vector<5x384xf32> to vector<5x32xf32>
    %cst_20 = arith.constant 0.176776692 : f32
    %52 = vector.broadcast %cst_20 : f32 to vector<5x32xf32>
    %53 = arith.mulf %51, %52 : vector<5x32xf32>
    %54 = vector.extract_strided_slice %29 {offsets = [0, 160], sizes = [5, 32], strides = [1, 1]} : vector<5x384xf32> to vector<5x32xf32>
    %55 = vector.extract_strided_slice %29 {offsets = [0, 288], sizes = [5, 32], strides = [1, 1]} : vector<5x384xf32> to vector<5x32xf32>
    %56 = arith.truncf %53 : vector<5x32xf32> to vector<5x32xbf16>
    %57 = arith.truncf %54 : vector<5x32xf32> to vector<5x32xbf16>
    %cst_21 = arith.constant dense<0.000000e+00> : vector<5x5xf32>
    %58 = tpu.matmul %56, %57, %cst_21 {dimension_numbers = #tpu.dot_dimension_numbers<[1], [1], [0], [0], [0, 0, 1, 0], [], []>} : vector<5x32xbf16>, vector<5x32xbf16>, vector<5x5xf32> -> vector<5x5xf32>
    %cst_22 = arith.constant dense<0xFF800000> : vector<5xf32>
    %59 = vector.multi_reduction <maximumf>, %58, %cst_22 [1] : vector<5x5xf32> to vector<5xf32>
    %60 = vector.shape_cast %59 : vector<5xf32> to vector<5x1xf32>
    %61 = vector.broadcast %60 : vector<5x1xf32> to vector<5x5xf32>
    %62 = arith.subf %58, %61 : vector<5x5xf32>
    %63 = math.exp %62 : vector<5x5xf32>
    %cst_23 = arith.constant dense<0.000000e+00> : vector<5xf32>
    %64 = vector.multi_reduction <add>, %63, %cst_23 [1] : vector<5x5xf32> to vector<5xf32>
    %65 = vector.shape_cast %64 : vector<5xf32> to vector<5x1xf32>
    %66 = tpu.reciprocal %65 {approx = true} : vector<5x1xf32> -> vector<5x1xf32>
    %67 = vector.broadcast %66 : vector<5x1xf32> to vector<5x5xf32>
    %68 = arith.mulf %63, %67 : vector<5x5xf32>
    %69 = arith.truncf %68 : vector<5x5xf32> to vector<5x5xbf16>
    %70 = arith.truncf %55 : vector<5x32xf32> to vector<5x32xbf16>
    %cst_24 = arith.constant dense<0.000000e+00> : vector<5x32xf32>
    %71 = tpu.matmul %69, %70, %cst_24 {dimension_numbers = #tpu.dot_dimension_numbers<[1], [0], [0], [1], [0, 0, 1, 1], [], []>} : vector<5x5xbf16>, vector<5x32xbf16>, vector<5x32xf32> -> vector<5x32xf32>
    %72 = vector.extract_strided_slice %29 {offsets = [0, 64], sizes = [5, 32], strides = [1, 1]} : vector<5x384xf32> to vector<5x32xf32>
    %cst_25 = arith.constant 0.176776692 : f32
    %73 = vector.broadcast %cst_25 : f32 to vector<5x32xf32>
    %74 = arith.mulf %72, %73 : vector<5x32xf32>
    %75 = vector.extract_strided_slice %29 {offsets = [0, 192], sizes = [5, 32], strides = [1, 1]} : vector<5x384xf32> to vector<5x32xf32>
    %76 = vector.extract_strided_slice %29 {offsets = [0, 320], sizes = [5, 32], strides = [1, 1]} : vector<5x384xf32> to vector<5x32xf32>
    %77 = arith.truncf %74 : vector<5x32xf32> to vector<5x32xbf16>
    %78 = arith.truncf %75 : vector<5x32xf32> to vector<5x32xbf16>
    %cst_26 = arith.constant dense<0.000000e+00> : vector<5x5xf32>
    %79 = tpu.matmul %77, %78, %cst_26 {dimension_numbers = #tpu.dot_dimension_numbers<[1], [1], [0], [0], [0, 0, 1, 0], [], []>} : vector<5x32xbf16>, vector<5x32xbf16>, vector<5x5xf32> -> vector<5x5xf32>
    %cst_27 = arith.constant dense<0xFF800000> : vector<5xf32>
    %80 = vector.multi_reduction <maximumf>, %79, %cst_27 [1] : vector<5x5xf32> to vector<5xf32>
    %81 = vector.shape_cast %80 : vector<5xf32> to vector<5x1xf32>
    %82 = vector.broadcast %81 : vector<5x1xf32> to vector<5x5xf32>
    %83 = arith.subf %79, %82 : vector<5x5xf32>
    %84 = math.exp %83 : vector<5x5xf32>
    %cst_28 = arith.constant dense<0.000000e+00> : vector<5xf32>
    %85 = vector.multi_reduction <add>, %84, %cst_28 [1] : vector<5x5xf32> to vector<5xf32>
    %86 = vector.shape_cast %85 : vector<5xf32> to vector<5x1xf32>
    %87 = tpu.reciprocal %86 {approx = true} : vector<5x1xf32> -> vector<5x1xf32>
    %88 = vector.broadcast %87 : vector<5x1xf32> to vector<5x5xf32>
    %89 = arith.mulf %84, %88 : vector<5x5xf32>
    %90 = arith.truncf %89 : vector<5x5xf32> to vector<5x5xbf16>
    %91 = arith.truncf %76 : vector<5x32xf32> to vector<5x32xbf16>
    %cst_29 = arith.constant dense<0.000000e+00> : vector<5x32xf32>
    %92 = tpu.matmul %90, %91, %cst_29 {dimension_numbers = #tpu.dot_dimension_numbers<[1], [0], [0], [1], [0, 0, 1, 1], [], []>} : vector<5x5xbf16>, vector<5x32xbf16>, vector<5x32xf32> -> vector<5x32xf32>
    %93 = vector.extract_strided_slice %29 {offsets = [0, 96], sizes = [5, 32], strides = [1, 1]} : vector<5x384xf32> to vector<5x32xf32>
    %cst_30 = arith.constant 0.176776692 : f32
    %94 = vector.broadcast %cst_30 : f32 to vector<5x32xf32>
    %95 = arith.mulf %93, %94 : vector<5x32xf32>
    %96 = vector.extract_strided_slice %29 {offsets = [0, 224], sizes = [5, 32], strides = [1, 1]} : vector<5x384xf32> to vector<5x32xf32>
    %97 = vector.extract_strided_slice %29 {offsets = [0, 352], sizes = [5, 32], strides = [1, 1]} : vector<5x384xf32> to vector<5x32xf32>
    %98 = arith.truncf %95 : vector<5x32xf32> to vector<5x32xbf16>
    %99 = arith.truncf %96 : vector<5x32xf32> to vector<5x32xbf16>
    %cst_31 = arith.constant dense<0.000000e+00> : vector<5x5xf32>
    %100 = tpu.matmul %98, %99, %cst_31 {dimension_numbers = #tpu.dot_dimension_numbers<[1], [1], [0], [0], [0, 0, 1, 0], [], []>} : vector<5x32xbf16>, vector<5x32xbf16>, vector<5x5xf32> -> vector<5x5xf32>
    %cst_32 = arith.constant dense<0xFF800000> : vector<5xf32>
    %101 = vector.multi_reduction <maximumf>, %100, %cst_32 [1] : vector<5x5xf32> to vector<5xf32>
    %102 = vector.shape_cast %101 : vector<5xf32> to vector<5x1xf32>
    %103 = vector.broadcast %102 : vector<5x1xf32> to vector<5x5xf32>
    %104 = arith.subf %100, %103 : vector<5x5xf32>
    %105 = math.exp %104 : vector<5x5xf32>
    %cst_33 = arith.constant dense<0.000000e+00> : vector<5xf32>
    %106 = vector.multi_reduction <add>, %105, %cst_33 [1] : vector<5x5xf32> to vector<5xf32>
    %107 = vector.shape_cast %106 : vector<5xf32> to vector<5x1xf32>
    %108 = tpu.reciprocal %107 {approx = true} : vector<5x1xf32> -> vector<5x1xf32>
    %109 = vector.broadcast %108 : vector<5x1xf32> to vector<5x5xf32>
    %110 = arith.mulf %105, %109 : vector<5x5xf32>
    %111 = arith.truncf %110 : vector<5x5xf32> to vector<5x5xbf16>
    %112 = arith.truncf %97 : vector<5x32xf32> to vector<5x32xbf16>
    %cst_34 = arith.constant dense<0.000000e+00> : vector<5x32xf32>
    %113 = tpu.matmul %111, %112, %cst_34 {dimension_numbers = #tpu.dot_dimension_numbers<[1], [0], [0], [1], [0, 0, 1, 1], [], []>} : vector<5x5xbf16>, vector<5x32xbf16>, vector<5x32xf32> -> vector<5x32xf32>
    %114 = tpu.concatenate %50, %71, %92, %113 in 1 : vector<5x32xf32>, vector<5x32xf32>, vector<5x32xf32>, vector<5x32xf32> -> vector<5x128xf32>
    %115 = arith.truncf %114 : vector<5x128xf32> to vector<5x128xbf16>
    %c0_35 = arith.constant 0 : index
    %c0_36 = arith.constant 0 : index
    %116 = vector.load %arg6[%c0_35, %c0_36] : memref<128x128xbf16, #tpu.memory_space<vmem>>, vector<128x128xbf16>
    %cst_37 = arith.constant dense<0.000000e+00> : vector<5x128xf32>
    %117 = tpu.matmul %115, %116, %cst_37 {dimension_numbers = #tpu.dot_dimension_numbers<[1], [0], [0], [1], [0, 0, 1, 1], [], []>} : vector<5x128xbf16>, vector<128x128xbf16>, vector<5x128xf32> -> vector<5x128xf32>
    %c0_38 = arith.constant 0 : index
    %c0_39 = arith.constant 0 : index
    %118 = vector.load %arg7[%c0_38, %c0_39] : memref<1x128xf32, #tpu.memory_space<vmem>>, vector<1x128xf32>
    %119 = vector.broadcast %118 : vector<1x128xf32> to vector<5x128xf32>
    %120 = arith.addf %117, %119 : vector<5x128xf32>
    %121 = arith.addf %1, %120 : vector<5x128xf32>
    %c0_40 = arith.constant 0 : index
    %c0_41 = arith.constant 0 : index
    %122 = vector.load %arg8[%c0_40, %c0_41] : memref<1x128xf32, #tpu.memory_space<vmem>>, vector<1x128xf32>
    %c0_42 = arith.constant 0 : index
    %c0_43 = arith.constant 0 : index
    %123 = vector.load %arg9[%c0_42, %c0_43] : memref<1x128xf32, #tpu.memory_space<vmem>>, vector<1x128xf32>
    %cst_44 = arith.constant dense<0.000000e+00> : vector<5xf32>
    %124 = vector.multi_reduction <add>, %121, %cst_44 [1] : vector<5x128xf32> to vector<5xf32>
    %125 = vector.shape_cast %124 : vector<5xf32> to vector<5x1xf32>
    %cst_45 = arith.constant 1.280000e+02 : f32
    %126 = vector.broadcast %cst_45 : f32 to vector<5x1xf32>
    %127 = arith.divf %125, %126 : vector<5x1xf32>
    %128 = vector.broadcast %127 : vector<5x1xf32> to vector<5x128xf32>
    %129 = arith.subf %121, %128 : vector<5x128xf32>
    %130 = arith.mulf %129, %129 : vector<5x128xf32>
    %cst_46 = arith.constant dense<0.000000e+00> : vector<5xf32>
    %131 = vector.multi_reduction <add>, %130, %cst_46 [1] : vector<5x128xf32> to vector<5xf32>
    %132 = vector.shape_cast %131 : vector<5xf32> to vector<5x1xf32>
    %cst_47 = arith.constant 1.280000e+02 : f32
    %133 = vector.broadcast %cst_47 : f32 to vector<5x1xf32>
    %134 = arith.divf %132, %133 : vector<5x1xf32>
    %cst_48 = arith.constant 9.99999997E-7 : f32
    %135 = vector.broadcast %cst_48 : f32 to vector<5x1xf32>
    %136 = arith.addf %134, %135 : vector<5x1xf32>
    %137 = math.rsqrt %136 : vector<5x1xf32>
    %138 = vector.broadcast %137 : vector<5x1xf32> to vector<5x128xf32>
    %139 = arith.mulf %129, %138 : vector<5x128xf32>
    %140 = vector.broadcast %122 : vector<1x128xf32> to vector<5x128xf32>
    %141 = arith.mulf %139, %140 : vector<5x128xf32>
    %142 = vector.broadcast %123 : vector<1x128xf32> to vector<5x128xf32>
    %143 = arith.addf %141, %142 : vector<5x128xf32>
    %144 = arith.truncf %143 : vector<5x128xf32> to vector<5x128xbf16>
    %c0_49 = arith.constant 0 : index
    %c0_50 = arith.constant 0 : index
    %145 = vector.load %arg10[%c0_49, %c0_50] : memref<128x512xbf16, #tpu.memory_space<vmem>>, vector<128x512xbf16>
    %cst_51 = arith.constant dense<0.000000e+00> : vector<5x512xf32>
    %146 = tpu.matmul %144, %145, %cst_51 {dimension_numbers = #tpu.dot_dimension_numbers<[1], [0], [0], [1], [0, 0, 1, 1], [], []>} : vector<5x128xbf16>, vector<128x512xbf16>, vector<5x512xf32> -> vector<5x512xf32>
    %c0_52 = arith.constant 0 : index
    %c0_53 = arith.constant 0 : index
    %147 = vector.load %arg11[%c0_52, %c0_53] : memref<1x512xf32, #tpu.memory_space<vmem>>, vector<1x512xf32>
    %148 = vector.broadcast %147 : vector<1x512xf32> to vector<5x512xf32>
    %149 = arith.addf %146, %148 : vector<5x512xf32>
    %cst_54 = arith.constant 5.000000e-01 : f32
    %150 = vector.broadcast %cst_54 : f32 to vector<5x512xf32>
    %151 = arith.mulf %150, %149 : vector<5x512xf32>
    %cst_55 = arith.constant 0.707106769 : f32
    %152 = vector.broadcast %cst_55 : f32 to vector<5x512xf32>
    %153 = arith.mulf %149, %152 : vector<5x512xf32>
    %154 = math.erf %153 : vector<5x512xf32>
    %cst_56 = arith.constant 1.000000e+00 : f32
    %155 = vector.broadcast %cst_56 : f32 to vector<5x512xf32>
    %156 = arith.addf %155, %154 : vector<5x512xf32>
    %157 = arith.mulf %151, %156 : vector<5x512xf32>
    %158 = arith.truncf %157 : vector<5x512xf32> to vector<5x512xbf16>
    %c0_57 = arith.constant 0 : index
    %c0_58 = arith.constant 0 : index
    %159 = vector.load %arg12[%c0_57, %c0_58] : memref<512x128xbf16, #tpu.memory_space<vmem>>, vector<512x128xbf16>
    %cst_59 = arith.constant dense<0.000000e+00> : vector<5x128xf32>
    %160 = tpu.matmul %158, %159, %cst_59 {dimension_numbers = #tpu.dot_dimension_numbers<[1], [0], [0], [1], [0, 0, 1, 1], [], []>} : vector<5x512xbf16>, vector<512x128xbf16>, vector<5x128xf32> -> vector<5x128xf32>
    %c0_60 = arith.constant 0 : index
    %c0_61 = arith.constant 0 : index
    %161 = vector.load %arg13[%c0_60, %c0_61] : memref<1x128xf32, #tpu.memory_space<vmem>>, vector<1x128xf32>
    %162 = vector.broadcast %161 : vector<1x128xf32> to vector<5x128xf32>
    %163 = arith.addf %160, %162 : vector<5x128xf32>
    %164 = arith.addf %121, %163 : vector<5x128xf32>
    %c0_62 = arith.constant 0 : index
    %c0_63 = arith.constant 0 : index
    %c0_64 = arith.constant 0 : index
    %165 = vector.load %arg14[%c0_62, %c0_63, %c0_64] : memref<1x5x128xf32, #tpu.memory_space<vmem>>, vector<1x5x128xf32>
    %166 = vector.shape_cast %165 : vector<1x5x128xf32> to vector<5x128xf32>
    %167 = vector.shape_cast %164 : vector<5x128xf32> to vector<1x5x128xf32>
    tpu.vector_store %arg14[%c0_62, %c0_63, %c0_64], %167 {strides = array<i32>} : memref<1x5x128xf32, #tpu.memory_space<vmem>>, vector<1x5x128xf32>,
    return
  }
  func.func @transform_0(%arg0: i32) -> (i32, i32, i32) {
    %c0_i32 = arith.constant 0 : i32
    %c0_i32_0 = arith.constant 0 : i32
    %c0_i32_1 = arith.constant 0 : i32
    return %arg0, %c0_i32, %c0_i32_0 : i32, i32, i32
  }
  func.func @transform_1(%arg0: i32) -> (i32, i32) {
    %c0_i32 = arith.constant 0 : i32
    %c0_i32_0 = arith.constant 0 : i32
    %c0_i32_1 = arith.constant 0 : i32
    return %c0_i32, %c0_i32_0 : i32, i32
  }
  func.func @transform_2(%arg0: i32) -> (i32, i32) {
    %c0_i32 = arith.constant 0 : i32
    %c0_i32_0 = arith.constant 0 : i32
    %c0_i32_1 = arith.constant 0 : i32
    return %c0_i32, %c0_i32_0 : i32, i32
  }
  func.func @transform_3(%arg0: i32) -> (i32, i32) {
    %c0_i32 = arith.constant 0 : i32
    %c0_i32_0 = arith.constant 0 : i32
    %c0_i32_1 = arith.constant 0 : i32
    return %c0_i32, %c0_i32_0 : i32, i32
  }
  func.func @transform_4(%arg0: i32) -> (i32, i32) {
    %c0_i32 = arith.constant 0 : i32
    %c0_i32_0 = arith.constant 0 : i32
    %c0_i32_1 = arith.constant 0 : i32
    return %c0_i32, %c0_i32_0 : i32, i32
  }
  func.func @transform_5(%arg0: i32) -> (i32, i32) {
    %c0_i32 = arith.constant 0 : i32
    %c0_i32_0 = arith.constant 0 : i32
    %c0_i32_1 = arith.constant 0 : i32
    return %c0_i32, %c0_i32_0 : i32, i32
  }
  func.func @transform_6(%arg0: i32) -> (i32, i32) {
    %c0_i32 = arith.constant 0 : i32
    %c0_i32_0 = arith.constant 0 : i32
    %c0_i32_1 = arith.constant 0 : i32
    return %c0_i32, %c0_i32_0 : i32, i32
  }
  func.func @transform_7(%arg0: i32) -> (i32, i32) {
    %c0_i32 = arith.constant 0 : i32
    %c0_i32_0 = arith.constant 0 : i32
    %c0_i32_1 = arith.constant 0 : i32
    return %c0_i32, %c0_i32_0 : i32, i32
  }
  func.func @transform_8(%arg0: i32) -> (i32, i32) {
    %c0_i32 = arith.constant 0 : i32
    %c0_i32_0 = arith.constant 0 : i32
    %c0_i32_1 = arith.constant 0 : i32
    return %c0_i32, %c0_i32_0 : i32, i32
  }
  func.func @transform_9(%arg0: i32) -> (i32, i32) {
    %c0_i32 = arith.constant 0 : i32
    %c0_i32_0 = arith.constant 0 : i32
    %c0_i32_1 = arith.constant 0 : i32
    return %c0_i32, %c0_i32_0 : i32, i32
  }
  func.func @transform_10(%arg0: i32) -> (i32, i32) {
    %c0_i32 = arith.constant 0 : i32
    %c0_i32_0 = arith.constant 0 : i32
    %c0_i32_1 = arith.constant 0 : i32
    return %c0_i32, %c0_i32_0 : i32, i32
  }
  func.func @transform_11(%arg0: i32) -> (i32, i32) {
    %c0_i32 = arith.constant 0 : i32
    %c0_i32_0 = arith.constant 0 : i32
    %c0_i32_1 = arith.constant 0 : i32
    return %c0_i32, %c0_i32_0 : i32, i32
  }
  func.func @transform_12(%arg0: i32) -> (i32, i32) {
    %c0_i32 = arith.constant 0 : i32
    %c0_i32_0 = arith.constant 0 : i32
    %c0_i32_1 = arith.constant 0 : i32
    return %c0_i32, %c0_i32_0 : i32, i32
  }
  func.func @transform_13(%arg0: i32) -> (i32, i32, i32) {
    %c0_i32 = arith.constant 0 : i32
    %c0_i32_0 = arith.constant 0 : i32
    %c0_i32_1 = arith.constant 0 : i32
    return %arg0, %c0_i32, %c0_i32_0 : i32, i32, i32
  }
}

</mosaic_0001>

<bundles_post_ra>
// kernel: image_encoder_vit_forward.7
= control target key start
LH: loop header
LB: loop body
LE: loop exit
PB: predicated region body
PF: predicated region fallthrough
CT: control target
= control target key end

     0   :  { %s301_s12 = smov 0   ;;  %s324_s0 = inlined_call_operand.vmem [shape: f32[2,5,128], index: 0, kind: input, shape index: {}]   ;;  %s325_s1 = inlined_call_operand.vmem [shape: f32[1,128], index: 1, kind: input, shape index: {}]   ;;  %s326_s2 = inlined_call_operand.vmem [shape: f32[1,128], index: 2, kind: input, shape index: {}]   ;;  %s327_s3 = inlined_call_operand.vmem [shape: f32[2,5,128], index: 3, kind: output, shape index: {}]  }
   0x1 LB: > { %s252_s13 = sadd.s32 4294967295, %s279_s12   ;;  %p256_p0 = scmp.ge.s32.totalorder %s279_s12, 1  ;;  %s279_s12 = sphi %s301_s12, %s13_s12  }
   0x2   : > { %p136_p1 = scmp.lt.s32.totalorder %s279_s12, 3 }
   0x4   : > { %p137_p2 = pnand %p256_p0, %p136_p1 }
   0x5   : > { %p158_p3 = scmp.lt.s32.totalorder (!%p137_p2), %s252_s13, 1  ;;  %vm169_vm0 = vcmask (!%p137_p2), 1044480   ;;  %v259_v11 = vld [vmem:[%s325_s1] ss:$0 sm:$0xff] (!%p137_p2) }
   0x6   : > { %140 = sbr.rel (%p137_p2) target bundleno = 331 (0x14b), region = 32  ;;  %v260_v13 = vld [vmem:[%s326_s2] ss:$0 sm:$0xff] (!%p137_p2) }
   0xd   : > { %s329_s13 = smov (!%p158_p3, %s252_s13), 1 }
   0xe   : > { %s257_s14 = sshll.u32 %s329_s13, 3 }
   0xf   : > { %s161_s17 = scalar_lea.vmem %s324_s0, %s257_s14  ;;  %s165_s24 = scalar_lea.vmem %s327_s3, %s257_s14 }
  0x10   : > { %v166_v0 = vld [vmem:[%s161_s17] sm:$0x1f] }
  0x11   : > { %v170_v1 = vsel %vm169_vm0, %v166_v0, 0.0 }
  0x12   : > { %171 = vadd.xlane.f32.xlu0 %v170_v1 }
  0x9f   : > { %v172_v2 = vpop.xlane.xlu0 %171 }
  0xa0   : > { %v174_v3 = vmul.f32 0.0078125, %v172_v2 }
  0xa2   : > { %v175_v4 = vsub.f32 %v166_v0, %v174_v3 }
  0xa4   : > { %v176_v5 = vmul.f32 %v175_v4, %v175_v4 }
  0xa6   : > { %v177_v6 = vsel %vm169_vm0, %v176_v5, 0.0 }
  0xa7   : > { %178 = vadd.xlane.f32.xlu0 %v177_v6 }
 0x134   : > { %v179_v7 = vpop.xlane.xlu0 %178 }
 0x135   : > { %v180_v8 = vmul.f32 0.0078125, %v179_v7 }
 0x137   : > { %v181_v9 = vadd.f32 1e-06, %v180_v8 }
 0x139   : > { %271 = vrsqrt.f32 %v181_v9 }
 0x143   : > { %v272_v10 = vpop.eup %271 }
 0x144   : > { %v183_v12 = vmul.f32 %v272_v10, %v175_v4 }
 0x146   : > { %v190_v14 = vmul.f32 %v259_v11, %v183_v12 }
 0x148   : > { %v197_v15 = vadd.f32 %v260_v13, %v190_v14 }
 0x14a   : > { %198 = vst [vmem:[%s165_s24] sm:$0x1f] %v197_v15 }
 0x14b PF: > { %s13_s12 = sadd.s32 1, %s279_s12  }
 0x14c   : > { %p10_p4 = scmp.ge.s32.totalorder %s13_s12, 4  }
 0x14e   :  { %12 = sbr.rel (!%p10_p4) target bundleno = 1 (0x1), region = 62 }

// kernel: image_encoder_vit_forward.4
= control target key start
LH: loop header
LB: loop body
LE: loop exit
PB: predicated region body
PF: predicated region fallthrough
CT: control target
= control target key end

     0   :  { %s1041_s18 = smov 0   ;;  %s1224_s0 = inlined_call_operand.vmem [shape: f32[2,4,768], index: 0, kind: input, shape index: {}]   ;;  %s1225_s1 = inlined_call_operand.vmem [shape: bf16[768,128], index: 1, kind: input, shape index: {}]   ;;  %s1226_s2 = inlined_call_operand.vmem [shape: f32[1,128], index: 2, kind: input, shape index: {}]   ;;  %s1227_s3 = inlined_call_operand.vmem [shape: f32[1,128], index: 3, kind: input, shape index: {}]   ;;  %s1228_s4 = inlined_call_operand.vmem [shape: f32[1,5,128], index: 4, kind: input, shape index: {}]   ;;  %s1229_s5 = inlined_call_operand.vmem [shape: f32[2,5,128], index: 5, kind: output, shape index: {}]  }
   0x1 LB: > { %s819_s19 = sadd.s32 4294967295, %s1009_s18   ;;  %p823_p0 = scmp.ge.s32.totalorder %s1009_s18, 1  ;;  %s1009_s18 = sphi %s1041_s18, %s15_s18  }
   0x2   : > { %p187_p1 = scmp.lt.s32.totalorder %s1009_s18, 3 }
   0x4   : > { %p188_p2 = pnand %p823_p0, %p187_p1 }
   0x5   : > { %v952_v0 = vld [vmem:[%s1225_s1 + $0x40] sm:$0xff] (!%p188_p2)   ;;  %v956_v4 = vld [vmem:[%s1225_s1 + $0x48] sm:$0xff] (!%p188_p2)   ;;  %v960_v8 = vld [vmem:[%s1225_s1 + $0x50] sm:$0xff] (!%p188_p2)   ;;  %p214_p3 = scmp.lt.s32.totalorder (!%p188_p2), %s819_s19, 1  ;;  %vm763_vm0 = vcmask (!%p188_p2), 1040384  }
   0x6   : > { %191 = sbr.rel (%p188_p2) target bundleno = 293 (0x125), region = 40  ;;  %v953_v1 = vld [vmem:[%s1225_s1] sm:$0xff] (!%p188_p2)   ;;  %877 = vmatprep.subr.bf16.mxu0 (!%p188_p2), %v952_v0  ;;  %v957_v5 = vld [vmem:[%s1225_s1 + $0x8] sm:$0xff] (!%p188_p2)   ;;  %v961_v9 = vld [vmem:[%s1225_s1 + $0x10] sm:$0xff] (!%p188_p2)  }
   0x7   : > { %v954_v2 = vld [vmem:[%s1225_s1 + $0xc0] sm:$0xff] (!%p188_p2)   ;;  %878 = vmatpush3.bf16.msra.mxu0 (!%p188_p2), %v953_v1  ;;  %v958_v6 = vld [vmem:[%s1225_s1 + $0xc8] sm:$0xff] (!%p188_p2)   ;;  %v962_v10 = vld [vmem:[%s1225_s1 + $0xd0] sm:$0xff] (!%p188_p2)  }
   0x8   : > { %v955_v3 = vld [vmem:[%s1225_s1 + $0x80] sm:$0xff] (!%p188_p2)   ;;  %899 = vmatprep.subr.bf16.mxu1 (!%p188_p2), %v954_v2  ;;  %879 = vmatprep.subr.bf16.mxu0 (!%p188_p2), %v956_v4  ;;  %v959_v7 = vld [vmem:[%s1225_s1 + $0x88] sm:$0xff] (!%p188_p2)   ;;  %v963_v11 = vld [vmem:[%s1225_s1 + $0x90] sm:$0xff] (!%p188_p2)  }
   0x9   : > { %900 = vmatpush3.bf16.msra.mxu1 (!%p188_p2), %v955_v3  ;;  %v964_v12 = vld [vmem:[%s1225_s1 + $0x58] sm:$0xff] (!%p188_p2)   ;;  %v968_v16 = vld [vmem:[%s1225_s1 + $0x60] sm:$0xff] (!%p188_p2)   ;;  %v972_v20 = vld [vmem:[%s1225_s1 + $0x68] sm:$0xff] (!%p188_p2)  }
   0xa   : > { %901 = vmatprep.subr.bf16.mxu1 (!%p188_p2), %v958_v6  ;;  %v965_v13 = vld [vmem:[%s1225_s1 + $0x18] sm:$0xff] (!%p188_p2)   ;;  %v969_v17 = vld [vmem:[%s1225_s1 + $0x20] sm:$0xff] (!%p188_p2)   ;;  %v973_v21 = vld [vmem:[%s1225_s1 + $0x28] sm:$0xff] (!%p188_p2)  }
   0xb   : > { %880 = vmatpush3.bf16.msra.mxu0 (!%p188_p2), %v957_v5  ;;  %v966_v14 = vld [vmem:[%s1225_s1 + $0xd8] sm:$0xff] (!%p188_p2)   ;;  %v970_v18 = vld [vmem:[%s1225_s1 + $0xe0] sm:$0xff] (!%p188_p2)   ;;  %v974_v22 = vld [vmem:[%s1225_s1 + $0xe8] sm:$0xff] (!%p188_p2)  }
   0xc   : > { %881 = vmatprep.subr.bf16.mxu0 (!%p188_p2), %v960_v8  ;;  %v967_v15 = vld [vmem:[%s1225_s1 + $0x98] sm:$0xff] (!%p188_p2)   ;;  %v971_v19 = vld [vmem:[%s1225_s1 + $0xa0] sm:$0xff] (!%p188_p2)   ;;  %v975_v23 = vld [vmem:[%s1225_s1 + $0xa8] sm:$0xff] (!%p188_p2)  }
   0xd   : > { %902 = vmatpush3.bf16.msra.mxu1 %v959_v7  ;;  %s1231_s19 = smov (!%p214_p3, %s819_s19), 1  ;;  %v976_v24 = vld [vmem:[%s1225_s1 + $0x70] sm:$0xff]   ;;  %v980_v28 = vld [vmem:[%s1225_s1 + $0x78] sm:$0xff]   ;;  %v985_v35 = vld [vmem:[%s1225_s1 + $0x140] sm:$0xff]  }
   0xe   : > { %903 = vmatprep.subr.bf16.mxu1 %v962_v10  ;;  %s943_s24 = smul.u32 24, %s1231_s19  ;;  %v977_v25 = vld [vmem:[%s1225_s1 + $0x30] sm:$0xff]   ;;  %v981_v29 = vld [vmem:[%s1225_s1 + $0x38] sm:$0xff]   ;;  %v987_v39 = vld [vmem:[%s1225_s1 + $0x100] sm:$0xff]   ;;  %s825_s9 = sshll.u32 %s1231_s19, 3 }
   0xf   : > { %882 = vmatpush3.bf16.msra.mxu0 %v961_v9  ;;  %v978_v26 = vld [vmem:[%s1225_s1 + $0xf0] sm:$0xff]   ;;  %v982_v30 = vld [vmem:[%s1225_s1 + $0xf8] sm:$0xff]   ;;  %v988_v41 = vld [vmem:[%s1225_s1 + $0x148] sm:$0xff]   ;;  %s222_s13 = scalar_lea.vmem %s1229_s5, %s825_s9 }
  0x10   : > { %883 = vmatprep.subr.bf16.mxu0 %v964_v12  ;;  %v979_v27 = vld [vmem:[%s1225_s1 + $0xb0] sm:$0xff]   ;;  %s1146_s10 = scalar_lea.vmem %s1224_s0, %s943_s24  ;;  %v984_v33 = vld [vmem:[%s1225_s1 + $0xb8] sm:$0xff]   ;;  %v989_v43 = vld [vmem:[%s1225_s1 + $0x108] sm:$0xff]  }
  0x11   : > { %904 = vmatpush3.bf16.msra.mxu1 %v963_v11  ;;  %v224_v31 = vld [vmem:[%s1146_s10] sm:$0xff]  ;;  %v225_v36 = vld [vmem:[%s1146_s10 + $0x8] sm:$0xff]  ;;  %v990_v44 = vld [vmem:[%s1225_s1 + $0x150] sm:$0xff]  }
  0x12   : > { %905 = vmatprep.subr.bf16.mxu1 %v966_v14  ;;  %v230_v32 = vcombine.high %v224_v31, %v224_v31  ;;  %v236_v34 = vpack.c.bf16 %v224_v31, %v224_v31  ;;  %v231_v38 = vcombine.high %v225_v36, %v225_v36  ;;  %v238_v40 = vpack.c.bf16 %v225_v36, %v225_v36  ;;  %v991_v45 = vld [vmem:[%s1225_s1 + $0x110] sm:$0xff]   ;;  %v992_v46 = vld [vmem:[%s1225_s1 + $0x158] sm:$0xff]   ;;  %v994_v48 = vld [vmem:[%s1225_s1 + $0x160] sm:$0xff]  }
  0x13   : > { %884 = vmatpush3.bf16.msra.mxu0 %v965_v13  ;;  %v993_v47 = vld [vmem:[%s1225_s1 + $0x118] sm:$0xff]   ;;  %v226_v49 = vld [vmem:[%s1146_s10 + $0x10] sm:$0xff]  ;;  %v995_v51 = vld [vmem:[%s1225_s1 + $0x120] sm:$0xff]  }
  0x14   : > { %885 = vmatprep.subr.bf16.mxu0 %v968_v16  ;;  %v237_v37 = vpack.c.bf16 %v230_v32, %v230_v32  ;;  %v239_v42 = vpack.c.bf16 %v231_v38, %v231_v38  ;;  %v232_v50 = vcombine.high %v226_v49, %v226_v49  ;;  %v996_v52 = vld [vmem:[%s1225_s1 + $0x168] sm:$0xff]   ;;  %v998_v55 = vld [vmem:[%s1225_s1 + $0x170] sm:$0xff]   ;;  %v1000_v57 = vld [vmem:[%s1225_s1 + $0x178] sm:$0xff]   ;;  %v240_v59 = vpack.c.bf16 %v226_v49, %v226_v49 }
  0x15   : > { %906 = vmatpush3.bf16.msra.mxu1 %v967_v15  ;;  %v997_v54 = vld [vmem:[%s1225_s1 + $0x128] sm:$0xff]   ;;  %v999_v56 = vld [vmem:[%s1225_s1 + $0x130] sm:$0xff]   ;;  %v1001_v58 = vld [vmem:[%s1225_s1 + $0x138] sm:$0xff]  }
  0x16   : > { %907 = vmatprep.subr.bf16.mxu1 %v970_v18  ;;  %665 = vmatprep.mubr.bf16.mxu0 %v237_v37  ;;  %v241_v53 = vpack.c.bf16 %v232_v50, %v232_v50  ;;  %v826_v61 = vld [vmem:[%s1226_s2] ss:$0 sm:$0xff] }
  0x17   : > { %886 = vmatpush3.bf16.msra.mxu0 %v969_v17  ;;  %705 = vmatprep.mubr.bf16.mxu1 %v239_v42  ;;  %v753_v9 = vld [vmem:[%s1228_s4] sm:$0x1f] }
  0x18   : > { %887 = vmatprep.subr.bf16.mxu0 %v972_v20  ;;  %v757_v13 = vrot.slane %v753_v9, 1  ;;  %v754_v15 = vld [vmem:[%s1227_s3] sm:$0x1] }
  0x19   : > { %908 = vmatpush3.bf16.msra.mxu1 %v971_v19  ;;  %v755_v18 = vadd.f32 %v754_v15, %v753_v9 }
  0x1a   : > { %909 = vmatprep.subr.bf16.mxu1 %v974_v22 }
  0x1b   : > { %888 = vmatpush3.bf16.msra.mxu0 %v973_v21 }
  0x1c   : > { %889 = vmatprep.subr.bf16.mxu0 %v976_v24 }
  0x1d   : > { %910 = vmatpush3.bf16.msra.mxu1 %v975_v23 }
  0x1e   : > { %911 = vmatprep.subr.bf16.mxu1 %v978_v26 }
  0x1f   : > { %890 = vmatpush3.bf16.msra.mxu0 %v977_v25 }
  0x20   : > { %891 = vmatprep.subr.bf16.mxu0 %v980_v28 }
  0x21   : > { %912 = vmatpush3.bf16.msra.mxu1 %v979_v27 }
  0x22   : > { %913 = vmatprep.subr.bf16.mxu1 %v982_v30 }
  0x23   : > { %892 = vmatpush3.bf16.msra.mxu0 %v981_v29 }
  0x24   : > { %921 = vmatprep.subr.bf16.mxu0 %v985_v35 }
  0x25   : > { %914 = vmatpush3.bf16.msra.mxu1 %v984_v33 }
  0x26   : > { %666 = vmatmul.mubr.bf16.vlgmr.msra.gmra.mrb[0].mxu0 %v236_v34 }
  0x27   : > { %922 = vmatpush3.bf16.msra.mxu0 %v987_v39  ;;  %745 = vmatprep.mubr.bf16.mxu0 %v241_v53 }
  0x28   : > { %706 = vmatmul.mubr.bf16.vlgmr.msra.gmra.mrb[0].mxu1 %v238_v40  ;;  %923 = vmatprep.subr.bf16.mxu0 %v988_v41 }
  0x2b   : > { %924 = vmatpush3.bf16.msra.mxu0 %v989_v43 }
  0x2c   : > { %925 = vmatprep.subr.bf16.mxu0 %v990_v44 }
  0x2f   : > { %926 = vmatpush3.bf16.msra.mxu0 %v991_v45 }
  0x30   : > { %927 = vmatprep.subr.bf16.mxu0 %v992_v46 }
  0x33   : > { %928 = vmatpush3.bf16.msra.mxu0 %v993_v47 }
  0x34   : > { %929 = vmatprep.subr.bf16.mxu0 %v994_v48 }
  0x37   : > { %930 = vmatpush3.bf16.msra.mxu0 %v995_v51 }
  0x38   : > { %931 = vmatprep.subr.bf16.mxu0 %v996_v52 }
  0x3b   : > { %932 = vmatpush3.bf16.msra.mxu0 %v997_v54 }
  0x3c   : > { %933 = vmatprep.subr.bf16.mxu0 %v998_v55 }
  0x3f   : > { %934 = vmatpush3.bf16.msra.mxu0 %v999_v56 }
  0x40   : > { %935 = vmatprep.subr.bf16.mxu0 %v1000_v57 }
  0x43   : > { %936 = vmatpush3.bf16.msra.mxu0 %v1001_v58 }
  0x46   : > { %746 = vmatmul.mubr.bf16.vlgmr.msra.gmra.mrb[4].mxu0 %v240_v59 }
  0xf9   : > { %v893_v60 = vpop.f32.mrb[0].mxu0 }
  0xfa   : > { %v894_v62 = vpop.f32.mrb[1].mxu0 }
  0xfb   : > { %v895_v63 = vadd.f32 %v894_v62, %v893_v60  ;;  %v896_v0 = vpop.f32.mrb[2].mxu0  ;;  %v915_v1 = vpop.f32.mrb[0].mxu1 }
  0xfc   : > { %v897_v2 = vpop.f32.mrb[3].mxu0  ;;  %v916_v3 = vpop.f32.mrb[1].mxu1 }
  0xfd   : > { %v668_v4 = vadd.f32 %v895_v63, %v826_v61  ;;  %v917_v5 = vadd.f32 %v916_v3, %v915_v1  ;;  %v918_v6 = vpop.f32.mrb[2].mxu1 }
  0xfe   : > { %v919_v7 = vpop.f32.mrb[3].mxu1 }
  0xff   : > { %v708_v8 = vadd.f32 %v917_v5, %v668_v4 }
 0x119   : > { %v937_v10 = vpop.f32.mrb[4].mxu0 }
 0x11a   : > { %v938_v11 = vpop.f32.mrb[5].mxu0 }
 0x11b   : > { %v939_v12 = vadd.f32 %v938_v11, %v937_v10  ;;  %v940_v14 = vpop.f32.mrb[6].mxu0 }
 0x11c   : > { %v941_v16 = vpop.f32.mrb[7].mxu0 }
 0x11d   : > { %v748_v17 = vadd.f32 %v939_v12, %v708_v8 }
 0x11f   : > { %v759_v19 = vadd.f32 %v757_v13, %v748_v17 }
 0x121   : > { %v761_v20 = vrot.slane %v759_v19, 7 }
 0x123   : > { %v764_v21 = vsel %vm763_vm0, %v755_v18, %v761_v20 }
 0x124   : > { %765 = vst [vmem:[%s222_s13] sm:$0x1f] %v764_v21 }
 0x125 PF: > { %s15_s18 = sadd.s32 1, %s1009_s18  }
 0x126   : > { %p12_p4 = scmp.ge.s32.totalorder %s15_s18, 4  }
 0x128   :  { %14 = sbr.rel (!%p12_p4) target bundleno = 1 (0x1), region = 70 }

// kernel: image_encoder_vit_forward.5
= control target key start
LH: loop header
LB: loop body
LE: loop exit
PB: predicated region body
PF: predicated region fallthrough
CT: control target
= control target key end

     0   :  { %s2587_s25 = smov 0   ;;  %s3050_s0 = inlined_call_operand.vmem [shape: f32[2,5,128], index: 0, kind: input, shape index: {}]   ;;  %s3051_s1 = inlined_call_operand.vmem [shape: f32[1,128], index: 1, kind: input, shape index: {}, may-alias: {1,7}]   ;;  %s3052_s2 = inlined_call_operand.vmem [shape: f32[1,128], index: 2, kind: input, shape index: {}, may-alias: {2,6,8,12}]   ;;  %s3053_s3 = inlined_call_operand.vmem [shape: bf16[128,384], index: 3, kind: input, shape index: {}]   ;;  %s3054_s4 = inlined_call_operand.vmem [shape: f32[1,384], index: 4, kind: input, shape index: {}]   ;;  %s3055_s5 = inlined_call_operand.vmem [shape: bf16[128,128], index: 5, kind: input, shape index: {}]   ;;  %s3056_s6 = inlined_call_operand.vmem [shape: f32[1,128], index: 6, kind: input, shape index: {}, may-alias: {2,6,8,12}]   ;;  %s3057_s7 = inlined_call_operand.vmem [shape: f32[1,128], index: 7, kind: input, shape index: {}, may-alias: {1,7}]   ;;  %s3058_s8 = inlined_call_operand.vmem [shape: f32[1,128], index: 8, kind: input, shape index: {}, may-alias: {2,6,8,12}]   ;;  %s3059_s9 = inlined_call_operand.vmem [shape: bf16[128,512], index: 9, kind: input, shape index: {}]   ;;  %s3060_s10 = inlined_call_operand.vmem [shape: f32[1,512], index: 10, kind: input, shape index: {}]   ;;  %s3061_s11 = inlined_call_operand.vmem [shape: bf16[512,128], index: 11, kind: input, shape index: {}]   ;;  %s3062_s12 = inlined_call_operand.vmem [shape: f32[1,128], index: 12, kind: input, shape index: {}, may-alias: {2,6,8,12}]   ;;  %s3063_s13 = inlined_call_operand.vmem [shape: f32[2,5,128], index: 13, kind: output, shape index: {}]  }
   0x1 LB: > { %s2054_s26 = sadd.s32 4294967295, %s2508_s25   ;;  %p2058_p0 = scmp.ge.s32.totalorder %s2508_s25, 1  ;;  %s2508_s25 = sphi %s2587_s25, %s23_s25  }
   0x2   : > { %p386_p1 = scmp.lt.s32.totalorder %s2508_s25, 3 }
   0x4   : > { %p387_p2 = pnand %p2058_p0, %p386_p1 }
   0x5   : > { %p428_p3 = scmp.lt.s32.totalorder (!%p387_p2), %s2054_s26, 1  ;;  %vm440_vm0 = vcmask (!%p387_p2), 1044480   ;;  %v2354_v2 = vld [vmem:[%s3053_s3 + $0x4] ss:$12 sps:$4 sm:$0xff] (!%p387_p2)   ;;  %v2356_v3 = vld [vmem:[%s3053_s3] ss:$12 sps:$4 sm:$0xff] (!%p387_p2)   ;;  %v504_v43 = vlaneseq (!%p387_p2) }
   0x6   : > { %390 = sbr.rel (%p387_p2) target bundleno = 2956 (0xb8c), region = 72  ;;  %v2510_v4 = vmov (!%p387_p2), 0.0   ;;  %v2357_v5 = vld [vmem:[%s3053_s3 + $0x8] ss:$12 sps:$4 sm:$0xff] (!%p387_p2)   ;;  %v2360_v7 = vld [vmem:[%s3053_s3 + $0x18] ss:$12 sps:$4 sm:$0xff] (!%p387_p2)   ;;  %647 = vmatprep.subr.bf16.mxu0 (!%p387_p2), %v2354_v2 }
   0x7   : > { %2251 = vmatprep.subr.bf16.mxu1 (!%p387_p2), %v2510_v4  ;;  %v2358_v6 = vld [vmem:[%s3053_s3 + $0x1c] ss:$12 sps:$4 sm:$0xff] (!%p387_p2)   ;;  %v2361_v8 = vld [vmem:[%s3053_s3 + $0x20] ss:$12 sps:$4 sm:$0xff] (!%p387_p2)   ;;  %648 = vmatpush1.bf16.msra.mxu0 (!%p387_p2), %v2356_v3  ;;  %v2365_v16 = vld [vmem:[%s3053_s3 + $0x38] ss:$12 sps:$4 sm:$0xff] (!%p387_p2)  }
   0x8   : > { %v2362_v9 = vld [vmem:[%s3053_s3 + $0x34] ss:$12 sps:$4 sm:$0xff] (!%p387_p2)   ;;  %2252 = vmatpush3.bf16.msra.mxu1 (!%p387_p2), %v2357_v5  ;;  %649 = vmatprep.subr.bf16.mxu0 (!%p387_p2), %v2358_v6  ;;  %v2364_v15 = vld [vmem:[%s3053_s3 + $0x30] ss:$12 sps:$4 sm:$0xff] (!%p387_p2)   ;;  %v2366_v17 = vld [vmem:[%s3053_s3 + $0x4c] ss:$12 sps:$4 sm:$0xff] (!%p387_p2)  }
   0x9   : > { %2253 = vmatprep.subr.bf16.mxu1 (!%p387_p2), %v2510_v4  ;;  %v2368_v18 = vld [vmem:[%s3053_s3 + $0x48] ss:$12 sps:$4 sm:$0xff] (!%p387_p2)   ;;  %v2369_v19 = vld [vmem:[%s3053_s3 + $0x50] ss:$12 sps:$4 sm:$0xff] (!%p387_p2)   ;;  %v2372_v21 = vld [vmem:[%s3053_s3 + $0x60] ss:$12 sps:$4 sm:$0xff] (!%p387_p2)  }
   0xa   : > { %v2370_v20 = vld [vmem:[%s3053_s3 + $0x64] ss:$12 sps:$4 sm:$0xff] (!%p387_p2)   ;;  %v2373_v22 = vld [vmem:[%s3053_s3 + $0x68] ss:$12 sps:$4 sm:$0xff] (!%p387_p2)   ;;  %v2377_v25 = vld [vmem:[%s3053_s3 + $0x80] ss:$12 sps:$4 sm:$0xff] (!%p387_p2)  }
   0xb   : > { %650 = vmatpush1.bf16.msra.mxu0 (!%p387_p2), %v2360_v7  ;;  %v2374_v23 = vld [vmem:[%s3053_s3 + $0x7c] ss:$12 sps:$4 sm:$0xff] (!%p387_p2)   ;;  %v2376_v24 = vld [vmem:[%s3053_s3 + $0x78] ss:$12 sps:$4 sm:$0xff] (!%p387_p2)   ;;  %v2378_v26 = vld [vmem:[%s3053_s3 + $0x94] ss:$12 sps:$4 sm:$0xff] (!%p387_p2)  }
   0xc   : > { %2254 = vmatpush3.bf16.msra.mxu1 (!%p387_p2), %v2361_v8  ;;  %651 = vmatprep.subr.bf16.mxu0 (!%p387_p2), %v2362_v9  ;;  %v2511_v27 = vmov (!%p387_p2), 0   ;;  %vm2512_vm1 = vmmov (!%p387_p2), 0   ;;  %v2380_v28 = vld [vmem:[%s3053_s3 + $0x90] ss:$12 sps:$4 sm:$0xff] (!%p387_p2)   ;;  %v2381_v29 = vld [vmem:[%s3053_s3 + $0x98] ss:$12 sps:$4 sm:$0xff] (!%p387_p2)  }
   0xd   : > { %s3065_s26 = smov (!%p428_p3, %s2054_s26), 1  ;;  %2255 = vmatprep.subr.bf16.mxu1 %v2510_v4  ;;  %679 = vmatprep.mubr.bf16.mxu0 %v2511_v27  ;;  %v2382_v30 = vld [vmem:[%s3053_s3 + $0xac] ss:$12 sps:$4 sm:$0xff]   ;;  %v2384_v31 = vld [vmem:[%s3053_s3 + $0xa8] ss:$12 sps:$4 sm:$0xff]   ;;  %v2704_v44 = vshrl.u32 %v504_v43, 7 }
   0xe   : > { %s2059_s27 = sshll.u32 %s3065_s26, 3  ;;  %2267 = vmatprep.mubr.msk.bf16.mxu1 %vm2512_vm1, %v2510_v4  ;;  %v2385_v32 = vld [vmem:[%s3053_s3 + $0xb0] ss:$12 sps:$4 sm:$0xff]   ;;  %v2061_v37 = vld [vmem:[%s3051_s1] ss:$0 sm:$0xff]  ;;  %vm731_vm2 = vcmask 261120  }
   0xf   : > { %s431_s30 = scalar_lea.vmem %s3050_s0, %s2059_s27  ;;  %652 = vmatpush1.bf16.msra.mxu0 %v2364_v15  ;;  %v2062_v39 = vld [vmem:[%s3052_s2] ss:$0 sm:$0xff]  ;;  %v510_v45 = vsub.s32 1, %v2704_v44  ;;  %v506_v47 = vsub.s32 0, %v2704_v44  ;;  %v514_v48 = vsub.s32 2, %v2704_v44  ;;  %vm796_vm3 = vcmask 1041408  }
  0x10   : > { %v2603_v0 = vld [vmem:[%s431_s30] sm:$0x1f]  ;;  %2256 = vmatpush3.bf16.msra.mxu1 %v2365_v16  ;;  %653 = vmatprep.subr.bf16.mxu0 %v2366_v17  ;;  %s2513_s29 = smov 96   ;;  %vm797_vm4 = vcmask 1042432   ;;  %v2514_v2 = vmov 65535   ;;  %s2515_s30 = smov 32  }
  0x11   : > { %v441_v1 = vsel %vm440_vm0, %v2603_v0, 0.0  ;;  %2257 = vmatprep.subr.bf16.mxu1 %v2510_v4  ;;  %v502_v46 = vld [vmem:[%s3054_s4] sm:$0x7]  ;;  %v798_v3 = vsel %vm796_vm3, 4294967295, %v2514_v2  ;;  %vm778_vm5 = vcmask 36864   ;;  %s2516_s14 = smov 64  }
  0x12   : > { %442 = vadd.xlane.f32.xlu0 %v441_v1  ;;  %v511_v49 = vrot.slane %v502_v46, %v510_v45  ;;  %v507_v50 = vrot.slane %v502_v46, %v506_v47  ;;  %v515_v53 = vrot.slane %v502_v46, %v514_v48  ;;  %v2724_v7 = vsel %vm797_vm4, %v798_v3, 0 }
  0x13   : > { %654 = vmatpush1.bf16.msra.mxu0 %v2368_v18  ;;  %vm792_vm6 = vcmask 39936   ;;  %vm1189_vm7 = vcmask 523264   ;;  %vm1191_vm8 = vcmask 785408  }
  0x14   : > { %2258 = vmatpush3.bf16.msra.mxu1 %v2369_v19  ;;  %655 = vmatprep.subr.bf16.mxu0 %v2370_v20 }
  0x15   : > { %2259 = vmatprep.subr.bf16.mxu1 %v2510_v4 }
  0x17   : > { %656 = vmatpush1.bf16.msra.mxu0 %v2372_v21 }
  0x18   : > { %2260 = vmatpush3.bf16.msra.mxu1 %v2373_v22  ;;  %657 = vmatprep.subr.bf16.mxu0 %v2374_v23 }
  0x19   : > { %2261 = vmatprep.subr.bf16.mxu1 %v2510_v4 }
  0x1b   : > { %658 = vmatpush1.bf16.msra.mxu0 %v2376_v24 }
  0x1c   : > { %2262 = vmatpush3.bf16.msra.mxu1 %v2377_v25  ;;  %659 = vmatprep.subr.bf16.mxu0 %v2378_v26 }
  0x1d   : > { %2263 = vmatprep.subr.bf16.mxu1 %v2510_v4 }
  0x1f   : > { %660 = vmatpush1.bf16.msra.mxu0 %v2380_v28 }
  0x20   : > { %2264 = vmatpush3.bf16.msra.mxu1 %v2381_v29  ;;  %661 = vmatprep.subr.bf16.mxu0 %v2382_v30 }
  0x21   : > { %2265 = vmatprep.subr.bf16.mxu1 %v2510_v4 }
  0x23   : > { %662 = vmatpush1.bf16.msra.mxu0 %v2384_v31 }
  0x24   : > { %2266 = vmatpush3.bf16.msra.mxu1 %v2385_v32  ;;  %2295 = vmatprep.subr.bf16.mxu0 %v2510_v4 }
  0x25   : > { %2271 = vmatprep.subr.bf16.mxu1 %v2510_v4 }
  0x9f   : > { %v443_v10 = vpop.xlane.xlu0 %442 }
  0xa0   : > { %v445_v11 = vmul.f32 0.0078125, %v443_v10 }
  0xa2   : > { %v446_v12 = vsub.f32 %v2603_v0, %v445_v11 }
  0xa4   : > { %v447_v13 = vmul.f32 %v446_v12, %v446_v12 }
  0xa6   : > { %v448_v14 = vsel %vm440_vm0, %v447_v13, 0.0 }
  0xa7   : > { %449 = vadd.xlane.f32.xlu0 %v448_v14 }
 0x134   : > { %v450_v33 = vpop.xlane.xlu0 %449 }
 0x135   : > { %v451_v34 = vmul.f32 0.0078125, %v450_v33 }
 0x137   : > { %v452_v35 = vadd.f32 1e-06, %v451_v34 }
 0x139   : > { %2474 = vrsqrt.f32 %v452_v35 }
 0x143   : > { %v2475_v36 = vpop.eup %2474 }
 0x144   : > { %v454_v38 = vmul.f32 %v2475_v36, %v446_v12 }
 0x146   : > { %v461_v40 = vmul.f32 %v2061_v37, %v454_v38 }
 0x148   : > { %v468_v41 = vadd.f32 %v2062_v39, %v461_v40 }
 0x14a   : > { %v469_v42 = vpack.c.bf16 %v468_v41, %v468_v41 }
 0x14c   : > { %680 = vmatmul.mubr.bf16.vlgmr.msra.gmra.mrb[0].mxu0 %v469_v42  ;;  %2268 = vmatmul.mubr.bf16.vlgmr.msra.gmra.mrb[0].mxu1 %v469_v42 }
 0x14d   : > { %2273 = vmatprep.mubr.msk.bf16.mxu1 %vm2512_vm1, %v2510_v4  ;;  %2297 = vmatprep.mubr.msk.bf16.mxu0 %vm2512_vm1, %v2510_v4 }
 0x21f   : > { %v681_v51 = vpop.f32.mrb[0].mxu0  ;;  %v722_v52 = vpop.f32.mrb[0].mxu1 }
 0x220   : > { %v683_v54 = vpop.f32.mrb[1].mxu0  ;;  %v2269_v55 = vpop.f32.mrb[1].mxu1  ;;  %v682_v61 = vadd.f32 %v681_v51, %v507_v50  ;;  %v723_v63 = vadd.f32 %v722_v52, %v515_v53 }
 0x221   : > { %v684_v56 = vadd.f32 %v683_v54, %v511_v49  ;;  %v685_v57 = vpop.f32.mrb[2].mxu0  ;;  %v725_v58 = vpop.f32.mrb[2].mxu1 }
 0x222   : > { %v686_v59 = vpop.f32.mrb[3].mxu0  ;;  %v2270_v60 = vpop.f32.mrb[3].mxu1  ;;  %v728_v5 = vmul.f32 0.17677669, %v682_v61  ;;  %v2721_v6 = vpack.c.bf16 %v723_v63, %v723_v63 }
 0x223   : > { %v730_v62 = vpack.c.bf16 %v684_v56, %v684_v56 }
 0x224   : > { %v729_v8 = vpack.c.bf16 %v728_v5, %v728_v5  ;;  %v801_v9 = vand.u32 %v2724_v7, %v2721_v6 }
 0x225   : > { %847 = vrot.lane.b32.xlu0 %v730_v62, %s2513_s29  ;;  %v736_v1 = vsel %vm731_vm2, %v730_v62, 0 }
 0x226   : > { %2272 = vmatpush3.bf16.xpose.msra.mxu1 %v736_v1 }
 0x227   : > { %2277 = vmatprep.subr.bf16.mxu1 %v2510_v4 }
 0x229   : > { %1068 = vrot.lane.b32.xlu0 %v730_v62, %s2515_s30 }
 0x22d   : > { %2274 = vmatmul.mubr.msk.bf16.vlgmr.msra.gmra.mrb[4].mxu1 %vm731_vm2, %v729_v8 }
 0x22e   : > { %2278 = vmatpush3.bf16.msra.mxu1 %v801_v9  ;;  %2279 = vmatprep.mubr.msk.bf16.mxu1 %vm2512_vm1, %v2510_v4 }
 0x22f   : > { %2283 = vmatprep.subr.bf16.mxu1 %v2510_v4 }
 0x297   : > { %v848_v22 = vpop.permute.xlu0 %847 }
 0x298   : > { %v853_v30 = vsel %vm731_vm2, %v848_v22, 0 }
 0x29b   : > { %v1069_v28 = vpop.permute.xlu0 %1068 }
 0x29c   : > { %v1074_v32 = vsel %vm731_vm2, %v1069_v28, 0 }
 0x300   : > { %v772_v10 = vpop.f32.mrb[4].mxu1 }
 0x301   : > { %v2275_v11 = vpop.f32.mrb[5].mxu1  ;;  %v779_v12 = vsel %vm778_vm5, %v772_v10, -inf }
 0x302   : > { %780 = vmax.xlane.f32.xlu1 %v779_v12  ;;  %v775_v13 = vpop.f32.mrb[6].mxu1 }
 0x303   : > { %v2276_v14 = vpop.f32.mrb[7].mxu1 }
 0x38f   : > { %v781_v15 = vpop.xlane.xlu1 %780 }
 0x390   : > { %v782_v16 = vsub.f32 %v772_v10, %v781_v15 }
 0x392   : > { %v783_v17 = vmul.f32 1.442695, %v782_v16 }
 0x394   : > { %2476 = vpow2.f32 %v783_v17 }
 0x39e   : > { %v2477_v18 = vpop.eup %2476 }
 0x39f   : > { %v785_v19 = vsel %vm778_vm5, %v2477_v18, 0.0 }
 0x3a0   : > { %786 = vadd.xlane.f32.xlu1 %v785_v19 }
 0x3b1   : > { %844 = vrot.lane.b32.xlu1 %v729_v8, %s2513_s29 }
 0x3b5   : > { %958 = vrot.lane.b32.xlu1 %v730_v62, %s2516_s14 }
 0x3b9   : > { %956 = vrot.lane.b32.xlu1 %v729_v8, %s2516_s14 }
 0x3bd   : > { %1066 = vrot.lane.b32.xlu1 %v729_v8, %s2515_s30 }
 0x42d   : > { %v787_v20 = vpop.xlane.xlu1 %786 }
 0x42e   : > { %2478 = vrcp.f32 %v787_v20 }
 0x431   : > { %v845_v21 = vpop.permute.xlu1 %844 }
 0x435   : > { %v959_v23 = vpop.permute.xlu1 %958 }
 0x436   : > { %v964_v24 = vsel %vm731_vm2, %v959_v23, 0 }
 0x437   : > { %2296 = vmatpush3.bf16.xpose.msra.mxu0 %v964_v24 }
 0x438   : > { %v2479_v25 = vpop.eup %2478  ;;  %2307 = vmatprep.subr.bf16.mxu0 %v2510_v4 }
 0x439   : > { %v789_v26 = vmul.f32 %v2479_v25, %v2477_v18  ;;  %v957_v31 = vpop.permute.xlu1 %956 }
 0x43b   : > { %v790_v29 = vpack.c.bf16 %v789_v26, %v789_v26 }
 0x43d   : > { %2280 = vmatmul.mubr.msk.bf16.vlgmr.msra.gmra.mrb[8].mxu1 %vm792_vm6, %v790_v29  ;;  %v1067_v33 = vpop.permute.xlu1 %1066 }
 0x43e   : > { %2284 = vmatpush3.bf16.xpose.msra.mxu1 %v853_v30  ;;  %2298 = vmatmul.mubr.msk.bf16.vlgmr.msra.gmra.mrb[4].mxu0 %vm731_vm2, %v957_v31  ;;  %v2386_v30 = vld [vmem:[%s3055_s5] sm:$0xff]   ;;  %v2388_v31 = vld [vmem:[%s3055_s5 + $0x10] sm:$0xff]  }
 0x43f   : > { %2308 = vmatpush3.bf16.xpose.msra.mxu0 %v1074_v32  ;;  %2285 = vmatprep.mubr.msk.bf16.mxu1 %vm2512_vm1, %v2510_v4  ;;  %v2389_v32 = vld [vmem:[%s3055_s5 + $0x18] sm:$0xff]  }
 0x440   : > { %2309 = vmatprep.mubr.msk.bf16.mxu0 %vm2512_vm1, %v2510_v4  ;;  %2289 = vmatprep.subr.bf16.mxu1 %v2510_v4 }
 0x441   : > { %2319 = vmatprep.subr.bf16.mxu0 %v2510_v4 }
 0x445   : > { %2286 = vmatmul.mubr.msk.bf16.vlgmr.msra.gmra.mrb[12].mxu1 %vm731_vm2, %v845_v21 }
 0x446   : > { %2310 = vmatmul.mubr.msk.bf16.vlgmr.msra.gmra.mrb[8].mxu0 %vm731_vm2, %v1067_v33  ;;  %2291 = vmatprep.mubr.msk.bf16.mxu1 %vm2512_vm1, %v2510_v4  ;;  %v2390_v33 = vld [vmem:[%s3055_s5 + $0x20] sm:$0xff]  }
 0x447   : > { %2335 = vmatprep.mubr.msk.bf16.mxu0 %vm2512_vm1, %v2510_v4  ;;  %2320 = vmatpush3.bf16.msra.mxu0 %v2386_v30  ;;  %v2426_v30 = vld [vmem:[%s3059_s9 + $0xa4] ss:$16 sps:$4 sm:$0xff]  }
 0x448   : > { %2321 = vmatprep.subr.bf16.mxu0 %v2510_v4 }
 0x510   : > { %v2756_v34 = vpop.f32.mrb[8].mxu1 }
 0x511   : > { %v2281_v35 = vpop.f32.mrb[9].mxu1  ;;  %v1000_v36 = vpop.f32.mrb[4].mxu0 }
 0x512   : > { %v840_v37 = vpop.f32.mrb[10].mxu1  ;;  %v2299_v38 = vpop.f32.mrb[5].mxu0  ;;  %v1006_v39 = vsel %vm778_vm5, %v1000_v36, -inf  ;;  %v2391_v35 = vld [vmem:[%s3055_s5 + $0x28] sm:$0xff]  }
 0x513   : > { %1007 = vmax.xlane.f32.xlu1 %v1006_v39  ;;  %v2282_v40 = vpop.f32.mrb[11].mxu1  ;;  %v1003_v41 = vpop.f32.mrb[6].mxu0 }
 0x514   : > { %v2300_v42 = vpop.f32.mrb[7].mxu0  ;;  %v2393_v41 = vld [vmem:[%s3055_s5 + $0x38] sm:$0xff]  }
 0x518   : > { %v889_v43 = vpop.f32.mrb[12].mxu1 }
 0x519   : > { %v2287_v46 = vpop.f32.mrb[13].mxu1  ;;  %v1110_v49 = vpop.f32.mrb[8].mxu0  ;;  %v895_v50 = vsel %vm778_vm5, %v889_v43, -inf }
 0x51a   : > { %v2311_v51 = vpop.f32.mrb[9].mxu0  ;;  %896 = vmax.xlane.f32.xlu0 %v895_v50  ;;  %v892_v52 = vpop.f32.mrb[14].mxu1  ;;  %v1116_v56 = vsel %vm778_vm5, %v1110_v49, -inf }
 0x51b   : > { %v2288_v53 = vpop.f32.mrb[15].mxu1  ;;  %v1113_v54 = vpop.f32.mrb[10].mxu0 }
 0x51c   : > { %v2312_v55 = vpop.f32.mrb[11].mxu0 }
 0x51e   : > { %1117 = vmax.xlane.f32.xlu0 %v1116_v56 }
 0x5a0   : > { %v1008_v57 = vpop.xlane.xlu1 %1007 }
 0x5a1   : > { %v1009_v58 = vsub.f32 %v1000_v36, %v1008_v57  ;;  %v2392_v36 = vld [vmem:[%s3055_s5 + $0x30] sm:$0xff]  }
 0x5a3   : > { %v1010_v59 = vmul.f32 1.442695, %v1009_v58 }
 0x5a5   : > { %2480 = vpow2.f32 %v1010_v59 }
 0x5a7   : > { %v897_v60 = vpop.xlane.xlu0 %896 }
 0x5a8   : > { %v898_v61 = vsub.f32 %v889_v43, %v897_v60  ;;  %v2095_v60 = vld [vmem:[%s3056_s6] ss:$0 sm:$0xff] }
 0x5aa   : > { %v899_v62 = vmul.f32 1.442695, %v898_v61 }
 0x5ab   : > { %v1118_v63 = vpop.xlane.xlu0 %1117 }
 0x5ac   : > { %2482 = vpow2.f32 %v899_v62  ;;  %v1119_v1 = vsub.f32 %v1110_v49, %v1118_v63 }
 0x5ae   : > { %v1120_v2 = vmul.f32 1.442695, %v1119_v1 }
 0x5af   : > { %v2481_v3 = vpop.eup %2480 }
 0x5b0   : > { %2484 = vpow2.f32 %v1120_v2  ;;  %v1012_v5 = vsel %vm778_vm5, %v2481_v3, 0.0 }
 0x5b1   : > { %1013 = vadd.xlane.f32.xlu0 %v1012_v5  ;;  %v2396_v5 = vld [vmem:[%s3059_s9 + $0x4] ss:$16 sps:$4 sm:$0xff]  }
 0x5b6   : > { %v2483_v8 = vpop.eup %2482 }
 0x5b7   : > { %v901_v9 = vsel %vm778_vm5, %v2483_v8, 0.0 }
 0x5b8   : > { %902 = vadd.xlane.f32.xlu0 %v901_v9  ;;  %v2402_v9 = vld [vmem:[%s3059_s9 + $0x24] ss:$16 sps:$4 sm:$0xff]  }
 0x5ba   : > { %v2485_v10 = vpop.eup %2484 }
 0x5bb   : > { %v1122_v11 = vsel %vm778_vm5, %v2485_v10, 0.0 }
 0x5bc   : > { %1123 = vadd.xlane.f32.xlu1 %v1122_v11  ;;  %v2400_v11 = vld [vmem:[%s3059_s9 + $0x20] ss:$16 sps:$4 sm:$0xff]  }
 0x5cd   : > { %1018 = vrot.lane.b32.xlu1 %v2721_v6, %s2516_s14 }
 0x5ce   : > { %908 = vrot.lane.b32.xlu0 %v2721_v6, %s2513_s29 }
 0x5d1   : > { %1128 = vrot.lane.b32.xlu1 %v2721_v6, %s2515_s30 }
 0x63e   : > { %v1014_v12 = vpop.xlane.xlu0 %1013 }
 0x645   : > { %v903_v13 = vpop.xlane.xlu0 %902 }
 0x646   : > { %2486 = vrcp.f32 %v903_v13  ;;  %v2408_v13 = vld [vmem:[%s3059_s9 + $0x44] ss:$16 sps:$4 sm:$0xff]  }
 0x647   : > { %2488 = vrcp.f32 %v1014_v12  ;;  %v2403_v12 = vld [vmem:[%s3059_s9 + $0x28] ss:$16 sps:$4 sm:$0xff]  }
 0x649   : > { %v909_v14 = vpop.permute.xlu0 %908  ;;  %v1124_v16 = vpop.xlane.xlu1 %1123 }
 0x64a   : > { %v914_v15 = vand.u32 %v909_v14, %v2724_v7  ;;  %2490 = vrcp.f32 %v1124_v16  ;;  %v2411_v14 = vld [vmem:[%s3059_s9 + $0x4c] ss:$16 sps:$4 sm:$0xff]   ;;  %v2409_v16 = vld [vmem:[%s3059_s9 + $0x48] ss:$16 sps:$4 sm:$0xff]  }
 0x64c   : > { %2290 = vmatpush3.bf16.msra.mxu1 %v914_v15  ;;  %v2406_v15 = vld [vmem:[%s3059_s9 + $0x40] ss:$16 sps:$4 sm:$0xff]  }
 0x64d   : > { %2301 = vmatprep.subr.bf16.mxu1 %v2510_v4  ;;  %v1019_v19 = vpop.permute.xlu1 %1018 }
 0x64e   : > { %v1024_v22 = vand.u32 %v1019_v19, %v2724_v7 }
 0x650   : > { %v2487_v17 = vpop.eup %2486 }
 0x651   : > { %v905_v18 = vmul.f32 %v2487_v17, %v2483_v8  ;;  %v2489_v21 = vpop.eup %2488  ;;  %v1129_v23 = vpop.permute.xlu1 %1128  ;;  %v2397_v8 = vld [vmem:[%s3059_s9 + $0x8] ss:$16 sps:$4 sm:$0xff]  }
 0x652   : > { %v1016_v6 = vmul.f32 %v2489_v21, %v2481_v3  ;;  %v1134_v26 = vand.u32 %v1129_v23, %v2724_v7  ;;  %v2387_v7 = vld [vmem:[%s3055_s5 + $0x8] sm:$0xff]   ;;  %v2412_v23 = vld [vmem:[%s3059_s9 + $0x60] ss:$16 sps:$4 sm:$0xff]  }
 0x653   : > { %v906_v20 = vpack.c.bf16 %v905_v18, %v905_v18  ;;  %2322 = vmatpush3.bf16.msra.mxu0 %v2387_v7  ;;  %v2429_v7 = vld [vmem:[%s3059_s9 + $0xac] ss:$16 sps:$4 sm:$0xff]  }
 0x654   : > { %v1017_v24 = vpack.c.bf16 %v1016_v6, %v1016_v6  ;;  %v2491_v25 = vpop.eup %2490  ;;  %2323 = vmatprep.subr.bf16.mxu0 %v2510_v4  ;;  %v2417_v6 = vld [vmem:[%s3059_s9 + $0x6c] ss:$16 sps:$4 sm:$0xff]  }
 0x655   : > { %2292 = vmatmul.mubr.msk.bf16.vlgmr.msra.gmra.mrb[16].mxu1 %vm792_vm6, %v906_v20  ;;  %v1126_v28 = vmul.f32 %v2491_v25, %v2485_v10  ;;  %v2405_v10 = vld [vmem:[%s3059_s9 + $0x2c] ss:$16 sps:$4 sm:$0xff]   ;;  %v2420_v25 = vld [vmem:[%s3059_s9 + $0x84] ss:$16 sps:$4 sm:$0xff]  }
 0x656   : > { %2302 = vmatpush3.bf16.msra.mxu1 %v1024_v22  ;;  %2303 = vmatprep.mubr.msk.bf16.mxu1 %vm2512_vm1, %v2510_v4  ;;  %v2414_v22 = vld [vmem:[%s3059_s9 + $0x64] ss:$16 sps:$4 sm:$0xff]  }
 0x657   : > { %2313 = vmatprep.subr.bf16.mxu1 %v2510_v4  ;;  %v1127_v29 = vpack.c.bf16 %v1126_v28, %v1126_v28  ;;  %2324 = vmatpush3.bf16.msra.mxu0 %v2388_v31  ;;  %v2418_v28 = vld [vmem:[%s3059_s9 + $0x80] ss:$16 sps:$4 sm:$0xff]  }
 0x658   : > { %2325 = vmatprep.subr.bf16.mxu0 %v2510_v4  ;;  %v2424_v31 = vld [vmem:[%s3059_s9 + $0xa0] ss:$16 sps:$4 sm:$0xff]  }
 0x65b   : > { %2326 = vmatpush3.bf16.msra.mxu0 %v2389_v32  ;;  %v2427_v32 = vld [vmem:[%s3059_s9 + $0xa8] ss:$16 sps:$4 sm:$0xff]  }
 0x65c   : > { %2327 = vmatprep.subr.bf16.mxu0 %v2510_v4 }
 0x65d   : > { %2304 = vmatmul.mubr.msk.bf16.vlgmr.msra.gmra.mrb[20].mxu1 %vm792_vm6, %v1017_v24  ;;  %v2415_v24 = vld [vmem:[%s3059_s9 + $0x68] ss:$16 sps:$4 sm:$0xff]  }
 0x65e   : > { %2314 = vmatpush3.bf16.msra.mxu1 %v1134_v26  ;;  %2315 = vmatprep.mubr.msk.bf16.mxu1 %vm2512_vm1, %v2510_v4  ;;  %v2423_v26 = vld [vmem:[%s3059_s9 + $0x8c] ss:$16 sps:$4 sm:$0xff]  }
 0x65f   : > { %2328 = vmatpush3.bf16.msra.mxu0 %v2390_v33  ;;  %1550 = vmatprep.subr.bf16.mxu1 %v2396_v5  ;;  %v2432_v33 = vld [vmem:[%s3059_s9 + $0xc4] ss:$16 sps:$4 sm:$0xff]   ;;  %v2455_v5 = vld [vmem:[%s3061_s11 + $0xd8] sm:$0xff]  }
 0x660   : > { %2329 = vmatprep.subr.bf16.mxu0 %v2510_v4 }
 0x663   : > { %2330 = vmatpush3.bf16.msra.mxu0 %v2391_v35  ;;  %v2435_v35 = vld [vmem:[%s3059_s9 + $0xcc] ss:$16 sps:$4 sm:$0xff]  }
 0x664   : > { %2331 = vmatprep.subr.bf16.mxu0 %v2510_v4 }
 0x665   : > { %2316 = vmatmul.mubr.msk.bf16.vlgmr.msra.gmra.mrb[24].mxu1 %vm792_vm6, %v1127_v29  ;;  %v2421_v29 = vld [vmem:[%s3059_s9 + $0x88] ss:$16 sps:$4 sm:$0xff]  }
 0x666   : > { %1582 = vmatprep.mubr.bf16.mxu1 %v2511_v27 }
 0x667   : > { %2332 = vmatpush3.bf16.msra.mxu0 %v2392_v36  ;;  %v2430_v36 = vld [vmem:[%s3059_s9 + $0xc0] ss:$16 sps:$4 sm:$0xff]  }
 0x668   : > { %2333 = vmatprep.subr.bf16.mxu0 %v2510_v4 }
 0x66b   : > { %2334 = vmatpush3.bf16.msra.mxu0 %v2393_v41  ;;  %v2439_v41 = vld [vmem:[%s3059_s9 + $0xe8] ss:$16 sps:$4 sm:$0xff]  }
 0x728   : > { %v950_v37 = vpop.f32.mrb[16].mxu1 }
 0x729   : > { %1177 = vrot.lane.b32.xlu1 %v950_v37, %s2515_s30  ;;  %v2293_v38 = vpop.f32.mrb[17].mxu1  ;;  %v2433_v37 = vld [vmem:[%s3059_s9 + $0xc8] ss:$16 sps:$4 sm:$0xff]   ;;  %s435_s30 = scalar_lea.vmem %s3063_s13, %s2059_s27 }
 0x72a   : > { %v953_v39 = vpop.f32.mrb[18].mxu1  ;;  %v2438_v38 = vld [vmem:[%s3059_s9 + $0xe4] ss:$16 sps:$4 sm:$0xff]  }
 0x72b   : > { %v2294_v40 = vpop.f32.mrb[19].mxu1  ;;  %v2441_v39 = vld [vmem:[%s3059_s9 + $0xec] ss:$16 sps:$4 sm:$0xff]  }
 0x72c   : > { %v2436_v40 = vld [vmem:[%s3059_s9 + $0xe0] ss:$16 sps:$4 sm:$0xff]  }
 0x730   : > { %v1060_v42 = vpop.f32.mrb[20].mxu1 }
 0x731   : > { %1181 = vrot.lane.b32.xlu0 %v1060_v42, %s2516_s14  ;;  %v2305_v43 = vpop.f32.mrb[21].mxu1  ;;  %v2442_v42 = vld [vmem:[%s3061_s11 + $0x40] sm:$0xff]  }
 0x732   : > { %v1063_v46 = vpop.f32.mrb[22].mxu1  ;;  %v2443_v43 = vld [vmem:[%s3061_s11 + $0xc0] sm:$0xff]  }
 0x733   : > { %v2306_v49 = vpop.f32.mrb[23].mxu1 }
 0x738   : > { %v1170_v50 = vpop.f32.mrb[24].mxu1 }
 0x739   : > { %1185 = vrot.lane.b32.xlu1 %v1170_v50, %s2513_s29  ;;  %v2317_v51 = vpop.f32.mrb[25].mxu1 }
 0x73a   : > { %v1173_v52 = vpop.f32.mrb[26].mxu1 }
 0x73b   : > { %v2318_v53 = vpop.f32.mrb[27].mxu1  ;;  %v2104_v52 = vld [vmem:[%s3057_s7] ss:$0 sm:$0xff] }
 0x79b   : > { %v1178_v54 = vpop.permute.xlu1 %1177 }
 0x79c   : > { %v1188_v55 = vsel %vm731_vm2, %v2756_v34, %v1178_v54  ;;  %v2105_v54 = vld [vmem:[%s3058_s8] ss:$0 sm:$0xff] }
 0x7a3   : > { %v1182_v4 = vpop.permute.xlu0 %1181 }
 0x7a4   : > { %v1190_v56 = vsel %vm1189_vm7, %v1188_v55, %v1182_v4 }
 0x7ab   : > { %v1186_v57 = vpop.permute.xlu1 %1185 }
 0x7ac   : > { %v1192_v58 = vsel %vm1191_vm8, %v1190_v56, %v1186_v57  ;;  %v2444_v56 = vld [vmem:[%s3061_s11] sm:$0xff]  }
 0x7ad   : > { %v1193_v59 = vpack.c.bf16 %v1192_v58, %v1192_v58  ;;  %v2445_v57 = vld [vmem:[%s3061_s11 + $0x80] sm:$0xff]  }
 0x7af   : > { %2336 = vmatmul.mubr.bf16.vlgmr.msra.gmra.mrb[12].mxu0 %v1193_v59  ;;  %v2446_v59 = vld [vmem:[%s3061_s11 + $0x48] sm:$0xff]  }
 0x7b0   : > { %1623 = vmatprep.mubr.bf16.mxu0 %v2511_v27  ;;  %v2394_v27 = vld [vmem:[%s3059_s9] ss:$16 sps:$4 sm:$0xff]  }
 0x7b1   : > { %1551 = vmatpush1.bf16.msra.mxu1 %v2394_v27  ;;  %v2454_v27 = vld [vmem:[%s3061_s11 + $0x58] sm:$0xff]  }
 0x7b2   : > { %1552 = vmatprep.subr.bf16.mxu1 %v2402_v9  ;;  %v2458_v9 = vld [vmem:[%s3061_s11 + $0x60] sm:$0xff]  }
 0x7b5   : > { %1553 = vmatpush1.bf16.msra.mxu1 %v2400_v11  ;;  %v2460_v11 = vld [vmem:[%s3061_s11 + $0x20] sm:$0xff]  }
 0x7b6   : > { %1554 = vmatprep.subr.bf16.mxu1 %v2408_v13  ;;  %v2462_v13 = vld [vmem:[%s3061_s11 + $0x68] sm:$0xff]  }
 0x7b9   : > { %1555 = vmatpush1.bf16.msra.mxu1 %v2406_v15  ;;  %v2464_v15 = vld [vmem:[%s3061_s11 + $0x28] sm:$0xff]  }
 0x7ba   : > { %1556 = vmatprep.subr.bf16.mxu1 %v2414_v22  ;;  %v2471_v22 = vld [vmem:[%s3061_s11 + $0xf8] sm:$0xff]  }
 0x7bd   : > { %1557 = vmatpush1.bf16.msra.mxu1 %v2412_v23  ;;  %v2473_v23 = vld [vmem:[%s3061_s11 + $0xb8] sm:$0xff]  }
 0x7be   : > { %1558 = vmatprep.subr.bf16.mxu1 %v2420_v25  ;;  %v1384_v25 = vsub.s32 3, %v2704_v44 }
 0x7c1   : > { %1559 = vmatpush1.bf16.msra.mxu1 %v2418_v28 }
 0x7c2   : > { %1560 = vmatprep.subr.bf16.mxu1 %v2426_v30 }
 0x7c5   : > { %1561 = vmatpush1.bf16.msra.mxu1 %v2424_v31 }
 0x7c6   : > { %1562 = vmatprep.subr.bf16.mxu1 %v2432_v33 }
 0x7c9   : > { %1563 = vmatpush1.bf16.msra.mxu1 %v2430_v36 }
 0x7ca   : > { %1564 = vmatprep.subr.bf16.mxu1 %v2438_v38 }
 0x7cd   : > { %1565 = vmatpush1.bf16.msra.mxu1 %v2436_v40 }
 0x7ce   : > { %2207 = vmatprep.subr.bf16.mxu1 %v2442_v42 }
 0x882   : > { %v1299_v61 = vpop.f32.mrb[12].mxu0 }
 0x883   : > { %v1300_v62 = vadd.f32 %v2095_v60, %v1299_v61  ;;  %v2337_v63 = vpop.f32.mrb[13].mxu0  ;;  %v2447_v60 = vld [vmem:[%s3061_s11 + $0xc8] sm:$0xff]  }
 0x884   : > { %v1302_v1 = vpop.f32.mrb[14].mxu0  ;;  %v2448_v61 = vld [vmem:[%s3061_s11 + $0x8] sm:$0xff]   ;;  %v2450_v63 = vld [vmem:[%s3061_s11 + $0x50] sm:$0xff]  }
 0x885   : > { %v2824_v2 = vadd.f32 %v1300_v62, %v2603_v0  ;;  %v2338_v3 = vpop.f32.mrb[15].mxu0  ;;  %v2399_v0 = vld [vmem:[%s3059_s9 + $0xc] ss:$16 sps:$4 sm:$0xff]   ;;  %v2451_v1 = vld [vmem:[%s3061_s11 + $0xd0] sm:$0xff]  }
 0x886   : > { %1591 = vmatprep.subr.bf16.mxu0 %v2399_v0  ;;  %v2449_v62 = vld [vmem:[%s3061_s11 + $0x88] sm:$0xff]   ;;  %v2452_v3 = vld [vmem:[%s3061_s11 + $0x10] sm:$0xff]   ;;  %v2457_v0 = vld [vmem:[%s3061_s11 + $0x98] sm:$0xff]  }
 0x887   : > { %v1308_v34 = vsel %vm440_vm0, %v2824_v2, 0.0  ;;  %1592 = vmatpush1.bf16.msra.mxu0 %v2397_v8  ;;  %v2456_v8 = vld [vmem:[%s3061_s11 + $0x18] sm:$0xff]  }
 0x888   : > { %1309 = vadd.xlane.f32.xlu0 %v1308_v34  ;;  %1593 = vmatprep.subr.bf16.mxu0 %v2405_v10  ;;  %v2453_v34 = vld [vmem:[%s3061_s11 + $0x90] sm:$0xff]   ;;  %v2459_v10 = vld [vmem:[%s3061_s11 + $0xe0] sm:$0xff]  }
 0x88b   : > { %1594 = vmatpush1.bf16.msra.mxu0 %v2403_v12  ;;  %v2461_v12 = vld [vmem:[%s3061_s11 + $0xa0] sm:$0xff]  }
 0x88c   : > { %1595 = vmatprep.subr.bf16.mxu0 %v2411_v14  ;;  %v2463_v14 = vld [vmem:[%s3061_s11 + $0xe8] sm:$0xff]  }
 0x88f   : > { %1596 = vmatpush1.bf16.msra.mxu0 %v2409_v16  ;;  %v2465_v16 = vld [vmem:[%s3061_s11 + $0xa8] sm:$0xff]  }
 0x890   : > { %1597 = vmatprep.subr.bf16.mxu0 %v2417_v6  ;;  %v2472_v6 = vld [vmem:[%s3061_s11 + $0x38] sm:$0xff]  }
 0x893   : > { %1598 = vmatpush1.bf16.msra.mxu0 %v2415_v24  ;;  %v1368_v24 = vld [vmem:[%s3060_s10] sm:$0xf] }
 0x894   : > { %1599 = vmatprep.subr.bf16.mxu0 %v2423_v26  ;;  %v1373_v26 = vrot.slane %v1368_v24, %v506_v47  ;;  %v1381_v28 = vrot.slane %v1368_v24, %v514_v48  ;;  %v1385_v30 = vrot.slane %v1368_v24, %v1384_v25 }
 0x897   : > { %1600 = vmatpush1.bf16.msra.mxu0 %v2421_v29  ;;  %v1377_v29 = vrot.slane %v1368_v24, %v510_v45 }
 0x898   : > { %1601 = vmatprep.subr.bf16.mxu0 %v2429_v7 }
 0x89b   : > { %1602 = vmatpush1.bf16.msra.mxu0 %v2427_v32 }
 0x89c   : > { %1603 = vmatprep.subr.bf16.mxu0 %v2435_v35 }
 0x89f   : > { %1604 = vmatpush1.bf16.msra.mxu0 %v2433_v37 }
 0x8a0   : > { %1605 = vmatprep.subr.bf16.mxu0 %v2441_v39 }
 0x8a3   : > { %1606 = vmatpush1.bf16.msra.mxu0 %v2439_v41 }
 0x8a4   : > { %2229 = vmatprep.subr.bf16.mxu0 %v2443_v43 }
 0x915   : > { %v1310_v17 = vpop.xlane.xlu0 %1309 }
 0x916   : > { %v1311_v18 = vmul.f32 0.0078125, %v1310_v17  ;;  %v2466_v17 = vld [vmem:[%s3061_s11 + $0x70] sm:$0xff]  }
 0x918   : > { %v1312_v19 = vsub.f32 %v2824_v2, %v1311_v18  ;;  %v2467_v18 = vld [vmem:[%s3061_s11 + $0xf0] sm:$0xff]  }
 0x91a   : > { %v1313_v20 = vmul.f32 %v1312_v19, %v1312_v19 }
 0x91c   : > { %v1314_v21 = vsel %vm440_vm0, %v1313_v20, 0.0  ;;  %v2469_v20 = vld [vmem:[%s3061_s11 + $0xb0] sm:$0xff]  }
 0x91d   : > { %1315 = vadd.xlane.f32.xlu1 %v1314_v21  ;;  %v2470_v21 = vld [vmem:[%s3061_s11 + $0x78] sm:$0xff]  }
 0x9aa   : > { %v1316_v46 = vpop.xlane.xlu1 %1315 }
 0x9ab   : > { %v1317_v49 = vmul.f32 0.0078125, %v1316_v46 }
 0x9ad   : > { %v1318_v50 = vadd.f32 1e-06, %v1317_v49 }
 0x9af   : > { %2492 = vrsqrt.f32 %v1318_v50 }
 0x9b9   : > { %v2493_v51 = vpop.eup %2492 }
 0x9ba   : > { %v1320_v53 = vmul.f32 %v2493_v51, %v1312_v19  ;;  %v2468_v19 = vld [vmem:[%s3061_s11 + $0x30] sm:$0xff]  }
 0x9bc   : > { %v1327_v4 = vmul.f32 %v2104_v52, %v1320_v53 }
 0x9be   : > { %v1334_v55 = vadd.f32 %v2105_v54, %v1327_v4 }
 0x9c0   : > { %v1335_v58 = vpack.c.bf16 %v1334_v55, %v1334_v55 }
 0x9c2   : > { %1583 = vmatmul.mubr.bf16.vlgmr.msra.gmra.mrb[28].mxu1 %v1335_v58  ;;  %1624 = vmatmul.mubr.bf16.vlgmr.msra.gmra.mrb[16].mxu0 %v1335_v58 }
 0x9c3   : > { %2208 = vmatpush3.bf16.msra.mxu1 %v2444_v56  ;;  %2230 = vmatpush3.bf16.msra.mxu0 %v2445_v57 }
 0x9c4   : > { %2209 = vmatprep.subr.bf16.mxu1 %v2446_v59  ;;  %2231 = vmatprep.subr.bf16.mxu0 %v2447_v60 }
 0x9c7   : > { %2210 = vmatpush3.bf16.msra.mxu1 %v2448_v61  ;;  %2232 = vmatpush3.bf16.msra.mxu0 %v2449_v62 }
 0x9c8   : > { %2211 = vmatprep.subr.bf16.mxu1 %v2450_v63  ;;  %2233 = vmatprep.subr.bf16.mxu0 %v2451_v1 }
 0x9cb   : > { %2212 = vmatpush3.bf16.msra.mxu1 %v2452_v3  ;;  %2234 = vmatpush3.bf16.msra.mxu0 %v2453_v34 }
 0x9cc   : > { %2213 = vmatprep.subr.bf16.mxu1 %v2454_v27  ;;  %2235 = vmatprep.subr.bf16.mxu0 %v2455_v5  ;;  %v2138_v5 = vld [vmem:[%s3062_s12] ss:$0 sm:$0xff] }
 0x9cf   : > { %2214 = vmatpush3.bf16.msra.mxu1 %v2456_v8  ;;  %2236 = vmatpush3.bf16.msra.mxu0 %v2457_v0 }
 0x9d0   : > { %2215 = vmatprep.subr.bf16.mxu1 %v2458_v9  ;;  %2237 = vmatprep.subr.bf16.mxu0 %v2459_v10 }
 0x9d3   : > { %2216 = vmatpush3.bf16.msra.mxu1 %v2460_v11  ;;  %2238 = vmatpush3.bf16.msra.mxu0 %v2461_v12 }
 0x9d4   : > { %2217 = vmatprep.subr.bf16.mxu1 %v2462_v13  ;;  %2239 = vmatprep.subr.bf16.mxu0 %v2463_v14 }
 0x9d7   : > { %2218 = vmatpush3.bf16.msra.mxu1 %v2464_v15  ;;  %2240 = vmatpush3.bf16.msra.mxu0 %v2465_v16 }
 0x9d8   : > { %2219 = vmatprep.subr.bf16.mxu1 %v2466_v17  ;;  %2241 = vmatprep.subr.bf16.mxu0 %v2467_v18 }
 0x9db   : > { %2220 = vmatpush3.bf16.msra.mxu1 %v2468_v19  ;;  %2242 = vmatpush3.bf16.msra.mxu0 %v2469_v20 }
 0x9dc   : > { %2221 = vmatprep.subr.bf16.mxu1 %v2470_v21  ;;  %2243 = vmatprep.subr.bf16.mxu0 %v2471_v22 }
 0x9df   : > { %2222 = vmatpush3.bf16.msra.mxu1 %v2472_v6  ;;  %2244 = vmatpush3.bf16.msra.mxu0 %v2473_v23 }
 0xa95   : > { %v1584_v7 = vpop.f32.mrb[28].mxu1  ;;  %v1625_v31 = vpop.f32.mrb[16].mxu0 }
 0xa96   : > { %v1585_v32 = vadd.f32 %v1584_v7, %v1373_v26  ;;  %v1626_v33 = vadd.f32 %v1625_v31, %v1381_v28  ;;  %v1586_v35 = vpop.f32.mrb[29].mxu1  ;;  %v1627_v36 = vpop.f32.mrb[17].mxu0 }
 0xa97   : > { %v1587_v37 = vadd.f32 %v1586_v35, %v1377_v29  ;;  %v1628_v38 = vadd.f32 %v1627_v36, %v1385_v30  ;;  %v1588_v39 = vpop.f32.mrb[30].mxu1  ;;  %v1629_v40 = vpop.f32.mrb[18].mxu0 }
 0xa98   : > { %v1636_v41 = vmul.f32 0.70710677, %v1585_v32  ;;  %v1638_v42 = vmul.f32 0.70710677, %v1626_v33  ;;  %v1589_v48 = vpop.f32.mrb[31].mxu1  ;;  %v1630_v46 = vpop.f32.mrb[19].mxu0 }
 0xa99   : > { %v1637_v47 = vmul.f32 0.70710677, %v1587_v37  ;;  %v1639_v43 = vmul.f32 0.70710677, %v1628_v38  ;;  %v1632_v51 = vmul.f32 0.5, %v1585_v32  ;;  %v1634_v54 = vmul.f32 0.5, %v1626_v33 }
 0xa9a   : > { %2494 = verf.f32 %v1636_v41  ;;  %v1633_v4 = vmul.f32 0.5, %v1587_v37  ;;  %v1635_v57 = vmul.f32 0.5, %v1628_v38 }
 0xa9b   : > { %2496 = verf.f32 %v1638_v42 }
 0xa9c   : > { %2498 = verf.f32 %v1637_v47 }
 0xa9d   : > { %2500 = verf.f32 %v1639_v43 }
 0xaa4   : > { %v2495_v44 = vpop.eup %2494 }
 0xaa5   : > { %v2497_v45 = vpop.eup %2496  ;;  %v1644_v49 = vadd.f32 1.0, %v2495_v44 }
 0xaa6   : > { %v2499_v50 = vpop.eup %2498  ;;  %v1646_v52 = vadd.f32 1.0, %v2497_v45 }
 0xaa7   : > { %v2501_v53 = vpop.eup %2500  ;;  %v1645_v55 = vadd.f32 1.0, %v2499_v50  ;;  %v1648_v56 = vmul.f32 %v1644_v49, %v1632_v51 }
 0xaa8   : > { %v1647_v58 = vadd.f32 1.0, %v2501_v53  ;;  %v1650_v59 = vmul.f32 %v1646_v52, %v1634_v54 }
 0xaa9   : > { %v1649_v60 = vmul.f32 %v1645_v55, %v1633_v4  ;;  %v1652_v63 = vpack.c.bf16 %v1648_v56, %v1648_v56 }
 0xaaa   : > { %v1651_v61 = vmul.f32 %v1647_v58, %v1635_v57  ;;  %v1654_v3 = vpack.c.bf16 %v1650_v59, %v1650_v59 }
 0xaab   : > { %v1653_v62 = vpack.c.bf16 %v1649_v60, %v1649_v60 }
 0xaac   : > { %v1655_v1 = vpack.c.bf16 %v1651_v61, %v1651_v61 }
 0xaad   : > { %1951 = vmatprep.mubr.bf16.mxu1 %v1653_v62 }
 0xaae   : > { %1991 = vmatprep.mubr.bf16.mxu0 %v1655_v1  ;;  %1952 = vmatmul.mubr.bf16.vlgmr.msra.gmra.mrb[32].mxu1 %v1652_v63 }
 0xaaf   : > { %1992 = vmatmul.mubr.bf16.vlgmr.msra.gmra.mrb[20].mxu0 %v1654_v3 }
 0xb81   : > { %v2223_v34 = vpop.f32.mrb[32].mxu1 }
 0xb82   : > { %v2245_v27 = vpop.f32.mrb[20].mxu0  ;;  %v2224_v8 = vpop.f32.mrb[33].mxu1 }
 0xb83   : > { %v2225_v0 = vadd.f32 %v2224_v8, %v2223_v34  ;;  %v2246_v9 = vpop.f32.mrb[21].mxu0  ;;  %v2226_v10 = vpop.f32.mrb[34].mxu1 }
 0xb84   : > { %v2247_v11 = vadd.f32 %v2246_v9, %v2245_v27  ;;  %v2248_v12 = vpop.f32.mrb[22].mxu0  ;;  %v2227_v13 = vpop.f32.mrb[35].mxu1 }
 0xb85   : > { %v1954_v14 = vadd.f32 %v2225_v0, %v2138_v5  ;;  %v2249_v15 = vpop.f32.mrb[23].mxu0 }
 0xb87   : > { %v1994_v16 = vadd.f32 %v2247_v11, %v1954_v14 }
 0xb89   : > { %v1999_v17 = vadd.f32 %v1994_v16, %v2824_v2 }
 0xb8b   : > { %2000 = vst [vmem:[%s435_s30] sm:$0x1f] %v1999_v17 }
 0xb8c PF: > { %s23_s25 = sadd.s32 1, %s2508_s25  }
 0xb8d   : > { %p20_p4 = scmp.ge.s32.totalorder %s23_s25, 4  }
 0xb8f   :  { %22 = sbr.rel (!%p20_p4) target bundleno = 1 (0x1), region = 102 }

</bundles_post_ra>
